<compile_context>
chip_gen: v7x
topology: tpu7x:2x2x1
jax: 0.10.0
libtpu: 0.0.40
codegen_flags: <defaults>
</compile_context>

<pallas_src>
import jax
import jax.numpy as jnp
import numpy as np
from jax import lax
from jax.experimental import pallas as pl
from jax.experimental.pallas import tpu as pltpu


# ---------------------------------------------------------------------------
# Static tap/phase layout for the folded (upsample -> 3x3 conv) weights.
#
# Output pixel (2h+a, 2w+b) of conv3x3(nearest_up2(x)) only ever reads
# original-resolution pixels at padded offsets dr, ds in {0,1,2} around (h, w).
# For output row-phase a and padded row offset dr, the 3x3 kernel rows that
# contribute are:
#     a=0: dr=0 -> {0}      dr=1 -> {1,2}
#     a=1: dr=1 -> {0,1}    dr=2 -> {2}
# (identically for columns).  So each of the 9 taps (dr, ds) is used by 1, 2
# or 4 of the 4 output phases; 16 folded Cin x Cout weight matrices in total.
# ---------------------------------------------------------------------------
_K_TABLE = {(0, 0): (0,), (0, 1): (1, 2), (1, 1): (0, 1), (1, 2): (2,)}


def _tap_layout():
    """For each tap (dr, ds): tuple of (phase, k_rows, k_cols, group_idx)."""
    layout, g = [], 0
    for dr in range(3):
        for ds in range(3):
            entries = []
            for a in range(2):
                ks = _K_TABLE.get((a, dr))
                if not ks:
                    continue
                for b in range(2):
                    ls = _K_TABLE.get((b, ds))
                    if not ls:
                        continue
                    entries.append((a * 2 + b, ks, ls, g))
                    g += 1
            layout.append(((dr, ds), tuple(entries)))
    assert g == 16
    return tuple(layout)


_TAP_LAYOUT = _tap_layout()


def _fold_weights(w3):
    """(3, 3, Cin, Cout) conv weights -> (16, Cin, Cout) folded tap/phase weights."""
    blocks = [None] * 16
    for _tap, entries in _TAP_LAYOUT:
        for (_p, ks, ls, g) in entries:
            wsum = jnp.zeros(w3.shape[2:], w3.dtype)
            for k in ks:
                for l in ls:
                    wsum = wsum + w3[k, l]
            blocks[g] = wsum
    return jnp.stack(blocks, axis=0)


def _upsample_conv_kernel(xpad_ref, w_ref, b_ref, o_ref):
    # xpad_ref: (H+2, W+2, Cin)   zero-padded input (one batch element)
    # w_ref:    (16, Cin, TCOUT)  folded tap/phase weights for this Cout tile
    # b_ref:    (1, TCOUT)        bias (f32)
    # o_ref:    (4, H, W, TCOUT)  phase-separated output tile
    hp2, wp2, cin = xpad_ref.shape
    H, W = hp2 - 2, wp2 - 2
    tc = o_ref.shape[-1]

    # f32 accumulators, initialized with the bias (saves one VPU pass / phase).
    bias = jnp.broadcast_to(b_ref[...].astype(jnp.float32), (H * W, tc))
    accs = [bias, bias, bias, bias]

    # 9 deduplicated tap slices; each tap feeds every phase that uses it.
    for (dr, ds), entries in _TAP_LAYOUT:
        x_tap = xpad_ref[pl.ds(dr, H), pl.ds(ds, W), :].reshape(H * W, cin)
        for (p, _ks, _ls, g) in entries:
            accs[p] = accs[p] + jnp.dot(
                x_tap, w_ref[g], preferred_element_type=jnp.float32)

    for p in range(4):
        o_ref[p] = accs[p].reshape(H, W, tc).astype(o_ref.dtype)


def _round_up(n, m):
    return (n + m - 1) // m * m


def _pick_cout_tile(cout):
    # Full-lane (multiple-of-128) Cout tiles keep output stores unmasked; cap
    # at 256 so 2x(weight block) + 2x(output block) fits the v7x 64 MiB VMEM.
    if cout % 256 == 0:
        return min(cout, 256)
    if cout % 128 == 0:
        return 128
    return cout  # tiny / unaligned channel counts: single tile


def _default_vmem_limit_bytes():
    # Scoped-VMEM defaults (16/32/32 MiB on v5e/v6e/v7x) are far below physical
    # capacity (128/128/64 MiB); raise the limit so large blocks stay
    # double-buffered, while leaving headroom for compiler scratch.
    try:
        cap = int(pltpu.get_tpu_info().vmem_capacity_bytes)
    except Exception:  # interpret mode / API drift: be conservative (v7x-sized)
        cap = 64 << 20
    return min(cap * 3 // 4, 100 << 20)


def make_upsample_params(key, channels, out_channels=None):
    """Synthetic conv params (HWIO layout), like nn.Conv2d(C, C_out, 3, padding=1)."""
    out_channels = out_channels or channels
    kw, kb = jax.random.split(key)
    w3 = jax.random.normal(kw, (3, 3, channels, out_channels), jnp.float32) * 0.1
    bias = jax.random.normal(kb, (out_channels,), jnp.float32) * 0.1
    return w3, bias


def upsample_forward(x_nchw, w3, bias, *, compute_dtype=jnp.bfloat16,
                     cout_tile=None, channel_pad=True, vmem_limit_bytes=None):
    """Upsample.forward for dims=2, use_conv=True, padding=1.

    x_nchw: (B, C, H, W) -> (B, Cout, 2H, 2W).  w3: (3, 3, Cin, Cout) HWIO.
    """
    B, C, H, W = x_nchw.shape
    cin, cout = w3.shape[2], w3.shape[3]
    assert C == cin, (C, cin)
    orig_cout = cout

    # Lane alignment: channel counts that are not a multiple of 128 (e.g. 320)
    # force masked partial stores and under-fill the MXU.  Zero-pad them up
    # (exact: zero Cin contributes nothing; extra Cout channels sliced below).
    # Skipped for tiny channel counts (toy/test shapes).
    if channel_pad and max(cin, cout) >= 128:
        cin_p, cout_p = _round_up(cin, 128), _round_up(cout, 128)
        if cin_p != cin:
            x_nchw = jnp.pad(x_nchw, ((0, 0), (0, cin_p - cin), (0, 0), (0, 0)))
            w3 = jnp.pad(w3, ((0, 0), (0, 0), (0, cin_p - cin), (0, 0)))
            cin = cin_p
        if cout_p != cout:
            w3 = jnp.pad(w3, ((0, 0), (0, 0), (0, 0), (0, cout_p - cout)))
            bias = jnp.pad(bias, ((0, cout_p - cout),))
            cout = cout_p

    # Glue (input-sized passes): NCHW -> NHWC, zero-pad the conv halo, cast the
    # MXU feed dtype (f32 accumulation happens inside the kernel).
    x_nhwc = jnp.transpose(x_nchw, (0, 2, 3, 1))
    xpad = jnp.pad(x_nhwc, ((0, 0), (1, 1), (1, 1), (0, 0))).astype(compute_dtype)
    weff = _fold_weights(w3).astype(compute_dtype)            # (16, Cin, Cout)
    b2d = bias.reshape(1, cout).astype(jnp.float32)

    tcout = int(cout_tile) if cout_tile is not None else _pick_cout_tile(cout)
    assert cout % tcout == 0, (cout, tcout)
    n_co = cout // tcout
    if vmem_limit_bytes is None:
        vmem_limit_bytes = _default_vmem_limit_bytes()
    out_dtype = x_nchw.dtype

    # TODO(synk): for very large spatial extents also tile H (needs overlapping
    # halo'd input blocks); DynamiCrafter latent H,W are small enough that the
    # Cout tiling alone bounds VMEM per grid step.
    out_phase = pl.pallas_call(
        _upsample_conv_kernel,
        out_shape=jax.ShapeDtypeStruct((B, 4, H, W, cout), out_dtype),
        grid=(B, n_co),
        in_specs=[
            # Same input block for every Cout tile; co is the inner grid axis,
            # so Pallas skips the redundant re-fetch between consecutive steps.
            pl.BlockSpec((None, H + 2, W + 2, cin), lambda b, co: (b, 0, 0, 0)),
            pl.BlockSpec((16, cin, tcout), lambda b, co: (0, 0, co)),
            pl.BlockSpec((1, tcout), lambda b, co: (0, co)),
        ],
        out_specs=pl.BlockSpec((None, 4, H, W, tcout),
                               lambda b, co: (b, 0, 0, 0, co)),
        compiler_params=pltpu.CompilerParams(
            dimension_semantics=("parallel", "parallel"),
            vmem_limit_bytes=int(vmem_limit_bytes),
        ),
    )(xpad, weff, b2d)

    # Glue (single output-sized pass): fold the phase interleave and the
    # NHWC -> NCHW layout change into ONE transpose:
    #   out[b, co, 2h+a, 2w+c] = out_phase[b, 2a+c, h, w, co]
    # TODO(synk): if the downstream consumer accepts NHWC, return
    # transpose(reshape(out_phase), (0,3,1,4,2,5)).reshape(B,2H,2W,C) instead
    # and drop the NCHW transpose entirely.
    y = out_phase.reshape(B, 2, 2, H, W, cout)
    y = jnp.transpose(y, (0, 5, 3, 1, 4, 2))                  # (B, Cout, H, 2, W, 2)
    y = y.reshape(B, cout, 2 * H, 2 * W)
    if cout != orig_cout:
        y = y[:, :orig_cout]
    return y


def _reference(x_nchw, w3, bias):
    """Pure-JAX reference: nearest 2x upsample then 3x3 conv (padding=1)."""
    x_nhwc = jnp.transpose(x_nchw, (0, 2, 3, 1))
    x_up = jnp.repeat(jnp.repeat(x_nhwc, 2, axis=1), 2, axis=2)
    ref = lax.conv_general_dilated(
        x_up, w3, window_strides=(1, 1), padding=((1, 1), (1, 1)),
        dimension_numbers=("NHWC", "HWIO", "NHWC"),
        precision=lax.Precision.HIGHEST,
    ) + bias[None, None, None, :]
    return jnp.transpose(ref, (0, 3, 1, 2))


if __name__ == "__main__":
    key = jax.random.PRNGKey(0)
    kx, kp, kx2, kp2 = jax.random.split(key, 4)

    fwd_f32 = jax.jit(lambda x, w, b: upsample_forward(x, w, b,
                                                       compute_dtype=jnp.float32))
    fwd_bf16 = jax.jit(lambda x, w, b: upsample_forward(x, w, b))

    # --- small config from the spec (channels=4, spatial=16) -----------------
    B, C, H, W = 2, 4, 16, 16
    x = jax.random.normal(kx, (B, C, H, W), jnp.float32)
    w3, bias = make_upsample_params(kp, C)
    ref = _reference(x, w3, bias)

    # strict semantic check: f32 MXU feed
    out = jax.block_until_ready(fwd_f32(x, w3, bias))
    assert out.shape == (B, C, 2 * H, 2 * W), out.shape
    np.testing.assert_allclose(np.asarray(out), np.asarray(ref),
                               rtol=2e-3, atol=2e-3)

    # performance-default path: bf16 MXU feed, f32 accumulation
    out_bf16 = jax.block_until_ready(fwd_bf16(x, w3, bias))
    np.testing.assert_allclose(np.asarray(out_bf16), np.asarray(ref),
                               rtol=5e-2, atol=5e-2)

    # --- wider-channel config exercising the Cout-tiled grid (2 Cout tiles) --
    B2, C2, CO2, H2, W2 = 1, 256, 512, 8, 8
    x2 = jax.random.normal(kx2, (B2, C2, H2, W2), jnp.float32)
    w32, bias2 = make_upsample_params(kp2, C2, CO2)
    ref2 = _reference(x2, w32, bias2)
    out2 = jax.block_until_ready(fwd_f32(x2, w32, bias2))
    assert out2.shape == (B2, CO2, 2 * H2, 2 * W2), out2.shape
    np.testing.assert_allclose(np.asarray(out2), np.asarray(ref2),
                               rtol=1e-2, atol=1e-2)

    print("KERNEL_OK")
</pallas_src>

<mosaic_0001>
module attributes {stable_mosaic.version = 11 : i64} {
  func.func @_upsample_conv_kernel(%arg0: i32, %arg1: i32, %arg2: memref<1x18x18x4xf32, #tpu.memory_space<vmem>>, %arg3: memref<16x4x4xf32, #tpu.memory_space<vmem>>, %arg4: memref<1x4xf32, #tpu.memory_space<vmem>>, %arg5: memref<1x4x16x16x4xf32, #tpu.memory_space<vmem>>) attributes {dimension_semantics = [#tpu.dimension_semantics<parallel>, #tpu.dimension_semantics<parallel>], iteration_bounds = array<i64: 2, 1>, scalar_prefetch = 0 : i64, scratch_operands = 0 : i64, tpu.core_type = #tpu.core_type<tc>, window_params = [{transform_indices = @transform_0, window_bounds = array<i64: 1, 18, 18, 4>}, {transform_indices = @transform_1, window_bounds = array<i64: 16, 4, 4>}, {transform_indices = @transform_2, window_bounds = array<i64: 1, 4>}, {transform_indices = @transform_3, window_bounds = array<i64: 1, 4, 16, 16, 4>}]} {
    %c0 = arith.constant 0 : index
    %c0_0 = arith.constant 0 : index
    %0 = vector.load %arg4[%c0, %c0_0] : memref<1x4xf32, #tpu.memory_space<vmem>>, vector<1x4xf32>
    %1 = vector.shape_cast %0 : vector<1x4xf32> to vector<1x4xf32>
    %2 = vector.broadcast %1 : vector<1x4xf32> to vector<256x4xf32>
    %c0_1 = arith.constant 0 : index
    %c0_2 = arith.constant 0 : index
    %c0_3 = arith.constant 0 : index
    %c0_4 = arith.constant 0 : index
    %3 = vector.load %arg2[%c0_1, %c0_2, %c0_3, %c0_4] : memref<1x18x18x4xf32, #tpu.memory_space<vmem>>, vector<1x16x16x4xf32>
    %4 = vector.shape_cast %3 : vector<1x16x16x4xf32> to vector<16x16x4xf32>
    %5 = vector.shape_cast %4 : vector<16x16x4xf32> to vector<256x4xf32>
    %c0_5 = arith.constant 0 : index
    %c0_6 = arith.constant 0 : index
    %c0_7 = arith.constant 0 : index
    %6 = vector.load %arg3[%c0_5, %c0_6, %c0_7] : memref<16x4x4xf32, #tpu.memory_space<vmem>>, vector<1x4x4xf32>
    %7 = vector.shape_cast %6 : vector<1x4x4xf32> to vector<4x4xf32>
    %cst = arith.constant dense<0.000000e+00> : vector<256x4xf32>
    %8 = tpu.matmul %5, %7, %cst {dimension_numbers = #tpu.dot_dimension_numbers<[1], [0], [0], [1], [0, 0, 1, 1], [], []>} : vector<256x4xf32>, vector<4x4xf32>, vector<256x4xf32> -> vector<256x4xf32>
    %9 = arith.addf %2, %8 : vector<256x4xf32>
    %c0_8 = arith.constant 0 : index
    %c0_9 = arith.constant 0 : index
    %c1 = arith.constant 1 : index
    %c0_10 = arith.constant 0 : index
    %10 = vector.load %arg2[%c0_8, %c0_9, %c1, %c0_10] : memref<1x18x18x4xf32, #tpu.memory_space<vmem>>, vector<1x16x16x4xf32>
    %11 = vector.shape_cast %10 : vector<1x16x16x4xf32> to vector<16x16x4xf32>
    %12 = vector.shape_cast %11 : vector<16x16x4xf32> to vector<256x4xf32>
    %c1_11 = arith.constant 1 : index
    %c0_12 = arith.constant 0 : index
    %c0_13 = arith.constant 0 : index
    %13 = vector.load %arg3[%c1_11, %c0_12, %c0_13] : memref<16x4x4xf32, #tpu.memory_space<vmem>>, vector<1x4x4xf32>
    %14 = vector.shape_cast %13 : vector<1x4x4xf32> to vector<4x4xf32>
    %cst_14 = arith.constant dense<0.000000e+00> : vector<256x4xf32>
    %15 = tpu.matmul %12, %14, %cst_14 {dimension_numbers = #tpu.dot_dimension_numbers<[1], [0], [0], [1], [0, 0, 1, 1], [], []>} : vector<256x4xf32>, vector<4x4xf32>, vector<256x4xf32> -> vector<256x4xf32>
    %16 = arith.addf %9, %15 : vector<256x4xf32>
    %c2 = arith.constant 2 : index
    %c0_15 = arith.constant 0 : index
    %c0_16 = arith.constant 0 : index
    %17 = vector.load %arg3[%c2, %c0_15, %c0_16] : memref<16x4x4xf32, #tpu.memory_space<vmem>>, vector<1x4x4xf32>
    %18 = vector.shape_cast %17 : vector<1x4x4xf32> to vector<4x4xf32>
    %cst_17 = arith.constant dense<0.000000e+00> : vector<256x4xf32>
    %19 = tpu.matmul %12, %18, %cst_17 {dimension_numbers = #tpu.dot_dimension_numbers<[1], [0], [0], [1], [0, 0, 1, 1], [], []>} : vector<256x4xf32>, vector<4x4xf32>, vector<256x4xf32> -> vector<256x4xf32>
    %20 = arith.addf %2, %19 : vector<256x4xf32>
    %c0_18 = arith.constant 0 : index
    %c0_19 = arith.constant 0 : index
    %c2_20 = arith.constant 2 : index
    %c0_21 = arith.constant 0 : index
    %21 = vector.load %arg2[%c0_18, %c0_19, %c2_20, %c0_21] : memref<1x18x18x4xf32, #tpu.memory_space<vmem>>, vector<1x16x16x4xf32>
    %22 = vector.shape_cast %21 : vector<1x16x16x4xf32> to vector<16x16x4xf32>
    %23 = vector.shape_cast %22 : vector<16x16x4xf32> to vector<256x4xf32>
    %c3 = arith.constant 3 : index
    %c0_22 = arith.constant 0 : index
    %c0_23 = arith.constant 0 : index
    %24 = vector.load %arg3[%c3, %c0_22, %c0_23] : memref<16x4x4xf32, #tpu.memory_space<vmem>>, vector<1x4x4xf32>
    %25 = vector.shape_cast %24 : vector<1x4x4xf32> to vector<4x4xf32>
    %cst_24 = arith.constant dense<0.000000e+00> : vector<256x4xf32>
    %26 = tpu.matmul %23, %25, %cst_24 {dimension_numbers = #tpu.dot_dimension_numbers<[1], [0], [0], [1], [0, 0, 1, 1], [], []>} : vector<256x4xf32>, vector<4x4xf32>, vector<256x4xf32> -> vector<256x4xf32>
    %27 = arith.addf %20, %26 : vector<256x4xf32>
    %c0_25 = arith.constant 0 : index
    %c1_26 = arith.constant 1 : index
    %c0_27 = arith.constant 0 : index
    %c0_28 = arith.constant 0 : index
    %28 = vector.load %arg2[%c0_25, %c1_26, %c0_27, %c0_28] : memref<1x18x18x4xf32, #tpu.memory_space<vmem>>, vector<1x16x16x4xf32>
    %29 = vector.shape_cast %28 : vector<1x16x16x4xf32> to vector<16x16x4xf32>
    %30 = vector.shape_cast %29 : vector<16x16x4xf32> to vector<256x4xf32>
    %c4 = arith.constant 4 : index
    %c0_29 = arith.constant 0 : index
    %c0_30 = arith.constant 0 : index
    %31 = vector.load %arg3[%c4, %c0_29, %c0_30] : memref<16x4x4xf32, #tpu.memory_space<vmem>>, vector<1x4x4xf32>
    %32 = vector.shape_cast %31 : vector<1x4x4xf32> to vector<4x4xf32>
    %cst_31 = arith.constant dense<0.000000e+00> : vector<256x4xf32>
    %33 = tpu.matmul %30, %32, %cst_31 {dimension_numbers = #tpu.dot_dimension_numbers<[1], [0], [0], [1], [0, 0, 1, 1], [], []>} : vector<256x4xf32>, vector<4x4xf32>, vector<256x4xf32> -> vector<256x4xf32>
    %34 = arith.addf %16, %33 : vector<256x4xf32>
    %c5 = arith.constant 5 : index
    %c0_32 = arith.constant 0 : index
    %c0_33 = arith.constant 0 : index
    %35 = vector.load %arg3[%c5, %c0_32, %c0_33] : memref<16x4x4xf32, #tpu.memory_space<vmem>>, vector<1x4x4xf32>
    %36 = vector.shape_cast %35 : vector<1x4x4xf32> to vector<4x4xf32>
    %cst_34 = arith.constant dense<0.000000e+00> : vector<256x4xf32>
    %37 = tpu.matmul %30, %36, %cst_34 {dimension_numbers = #tpu.dot_dimension_numbers<[1], [0], [0], [1], [0, 0, 1, 1], [], []>} : vector<256x4xf32>, vector<4x4xf32>, vector<256x4xf32> -> vector<256x4xf32>
    %38 = arith.addf %2, %37 : vector<256x4xf32>
    %c0_35 = arith.constant 0 : index
    %c1_36 = arith.constant 1 : index
    %c1_37 = arith.constant 1 : index
    %c0_38 = arith.constant 0 : index
    %39 = vector.load %arg2[%c0_35, %c1_36, %c1_37, %c0_38] : memref<1x18x18x4xf32, #tpu.memory_space<vmem>>, vector<1x16x16x4xf32>
    %40 = vector.shape_cast %39 : vector<1x16x16x4xf32> to vector<16x16x4xf32>
    %41 = vector.shape_cast %40 : vector<16x16x4xf32> to vector<256x4xf32>
    %c6 = arith.constant 6 : index
    %c0_39 = arith.constant 0 : index
    %c0_40 = arith.constant 0 : index
    %42 = vector.load %arg3[%c6, %c0_39, %c0_40] : memref<16x4x4xf32, #tpu.memory_space<vmem>>, vector<1x4x4xf32>
    %43 = vector.shape_cast %42 : vector<1x4x4xf32> to vector<4x4xf32>
    %cst_41 = arith.constant dense<0.000000e+00> : vector<256x4xf32>
    %44 = tpu.matmul %41, %43, %cst_41 {dimension_numbers = #tpu.dot_dimension_numbers<[1], [0], [0], [1], [0, 0, 1, 1], [], []>} : vector<256x4xf32>, vector<4x4xf32>, vector<256x4xf32> -> vector<256x4xf32>
    %45 = arith.addf %34, %44 : vector<256x4xf32>
    %c7 = arith.constant 7 : index
    %c0_42 = arith.constant 0 : index
    %c0_43 = arith.constant 0 : index
    %46 = vector.load %arg3[%c7, %c0_42, %c0_43] : memref<16x4x4xf32, #tpu.memory_space<vmem>>, vector<1x4x4xf32>
    %47 = vector.shape_cast %46 : vector<1x4x4xf32> to vector<4x4xf32>
    %cst_44 = arith.constant dense<0.000000e+00> : vector<256x4xf32>
    %48 = tpu.matmul %41, %47, %cst_44 {dimension_numbers = #tpu.dot_dimension_numbers<[1], [0], [0], [1], [0, 0, 1, 1], [], []>} : vector<256x4xf32>, vector<4x4xf32>, vector<256x4xf32> -> vector<256x4xf32>
    %49 = arith.addf %27, %48 : vector<256x4xf32>
    %c8 = arith.constant 8 : index
    %c0_45 = arith.constant 0 : index
    %c0_46 = arith.constant 0 : index
    %50 = vector.load %arg3[%c8, %c0_45, %c0_46] : memref<16x4x4xf32, #tpu.memory_space<vmem>>, vector<1x4x4xf32>
    %51 = vector.shape_cast %50 : vector<1x4x4xf32> to vector<4x4xf32>
    %cst_47 = arith.constant dense<0.000000e+00> : vector<256x4xf32>
    %52 = tpu.matmul %41, %51, %cst_47 {dimension_numbers = #tpu.dot_dimension_numbers<[1], [0], [0], [1], [0, 0, 1, 1], [], []>} : vector<256x4xf32>, vector<4x4xf32>, vector<256x4xf32> -> vector<256x4xf32>
    %53 = arith.addf %38, %52 : vector<256x4xf32>
    %c9 = arith.constant 9 : index
    %c0_48 = arith.constant 0 : index
    %c0_49 = arith.constant 0 : index
    %54 = vector.load %arg3[%c9, %c0_48, %c0_49] : memref<16x4x4xf32, #tpu.memory_space<vmem>>, vector<1x4x4xf32>
    %55 = vector.shape_cast %54 : vector<1x4x4xf32> to vector<4x4xf32>
    %cst_50 = arith.constant dense<0.000000e+00> : vector<256x4xf32>
    %56 = tpu.matmul %41, %55, %cst_50 {dimension_numbers = #tpu.dot_dimension_numbers<[1], [0], [0], [1], [0, 0, 1, 1], [], []>} : vector<256x4xf32>, vector<4x4xf32>, vector<256x4xf32> -> vector<256x4xf32>
    %57 = arith.addf %2, %56 : vector<256x4xf32>
    %c0_51 = arith.constant 0 : index
    %c1_52 = arith.constant 1 : index
    %c2_53 = arith.constant 2 : index
    %c0_54 = arith.constant 0 : index
    %58 = vector.load %arg2[%c0_51, %c1_52, %c2_53, %c0_54] : memref<1x18x18x4xf32, #tpu.memory_space<vmem>>, vector<1x16x16x4xf32>
    %59 = vector.shape_cast %58 : vector<1x16x16x4xf32> to vector<16x16x4xf32>
    %60 = vector.shape_cast %59 : vector<16x16x4xf32> to vector<256x4xf32>
    %c10 = arith.constant 10 : index
    %c0_55 = arith.constant 0 : index
    %c0_56 = arith.constant 0 : index
    %61 = vector.load %arg3[%c10, %c0_55, %c0_56] : memref<16x4x4xf32, #tpu.memory_space<vmem>>, vector<1x4x4xf32>
    %62 = vector.shape_cast %61 : vector<1x4x4xf32> to vector<4x4xf32>
    %cst_57 = arith.constant dense<0.000000e+00> : vector<256x4xf32>
    %63 = tpu.matmul %60, %62, %cst_57 {dimension_numbers = #tpu.dot_dimension_numbers<[1], [0], [0], [1], [0, 0, 1, 1], [], []>} : vector<256x4xf32>, vector<4x4xf32>, vector<256x4xf32> -> vector<256x4xf32>
    %64 = arith.addf %49, %63 : vector<256x4xf32>
    %c11 = arith.constant 11 : index
    %c0_58 = arith.constant 0 : index
    %c0_59 = arith.constant 0 : index
    %65 = vector.load %arg3[%c11, %c0_58, %c0_59] : memref<16x4x4xf32, #tpu.memory_space<vmem>>, vector<1x4x4xf32>
    %66 = vector.shape_cast %65 : vector<1x4x4xf32> to vector<4x4xf32>
    %cst_60 = arith.constant dense<0.000000e+00> : vector<256x4xf32>
    %67 = tpu.matmul %60, %66, %cst_60 {dimension_numbers = #tpu.dot_dimension_numbers<[1], [0], [0], [1], [0, 0, 1, 1], [], []>} : vector<256x4xf32>, vector<4x4xf32>, vector<256x4xf32> -> vector<256x4xf32>
    %68 = arith.addf %57, %67 : vector<256x4xf32>
    %c0_61 = arith.constant 0 : index
    %c2_62 = arith.constant 2 : index
    %c0_63 = arith.constant 0 : index
    %c0_64 = arith.constant 0 : index
    %69 = vector.load %arg2[%c0_61, %c2_62, %c0_63, %c0_64] : memref<1x18x18x4xf32, #tpu.memory_space<vmem>>, vector<1x16x16x4xf32>
    %70 = vector.shape_cast %69 : vector<1x16x16x4xf32> to vector<16x16x4xf32>
    %71 = vector.shape_cast %70 : vector<16x16x4xf32> to vector<256x4xf32>
    %c12 = arith.constant 12 : index
    %c0_65 = arith.constant 0 : index
    %c0_66 = arith.constant 0 : index
    %72 = vector.load %arg3[%c12, %c0_65, %c0_66] : memref<16x4x4xf32, #tpu.memory_space<vmem>>, vector<1x4x4xf32>
    %73 = vector.shape_cast %72 : vector<1x4x4xf32> to vector<4x4xf32>
    %cst_67 = arith.constant dense<0.000000e+00> : vector<256x4xf32>
    %74 = tpu.matmul %71, %73, %cst_67 {dimension_numbers = #tpu.dot_dimension_numbers<[1], [0], [0], [1], [0, 0, 1, 1], [], []>} : vector<256x4xf32>, vector<4x4xf32>, vector<256x4xf32> -> vector<256x4xf32>
    %75 = arith.addf %53, %74 : vector<256x4xf32>
    %c0_68 = arith.constant 0 : index
    %c2_69 = arith.constant 2 : index
    %c1_70 = arith.constant 1 : index
    %c0_71 = arith.constant 0 : index
    %76 = vector.load %arg2[%c0_68, %c2_69, %c1_70, %c0_71] : memref<1x18x18x4xf32, #tpu.memory_space<vmem>>, vector<1x16x16x4xf32>
    %77 = vector.shape_cast %76 : vector<1x16x16x4xf32> to vector<16x16x4xf32>
    %78 = vector.shape_cast %77 : vector<16x16x4xf32> to vector<256x4xf32>
    %c13 = arith.constant 13 : index
    %c0_72 = arith.constant 0 : index
    %c0_73 = arith.constant 0 : index
    %79 = vector.load %arg3[%c13, %c0_72, %c0_73] : memref<16x4x4xf32, #tpu.memory_space<vmem>>, vector<1x4x4xf32>
    %80 = vector.shape_cast %79 : vector<1x4x4xf32> to vector<4x4xf32>
    %cst_74 = arith.constant dense<0.000000e+00> : vector<256x4xf32>
    %81 = tpu.matmul %78, %80, %cst_74 {dimension_numbers = #tpu.dot_dimension_numbers<[1], [0], [0], [1], [0, 0, 1, 1], [], []>} : vector<256x4xf32>, vector<4x4xf32>, vector<256x4xf32> -> vector<256x4xf32>
    %82 = arith.addf %75, %81 : vector<256x4xf32>
    %c14 = arith.constant 14 : index
    %c0_75 = arith.constant 0 : index
    %c0_76 = arith.constant 0 : index
    %83 = vector.load %arg3[%c14, %c0_75, %c0_76] : memref<16x4x4xf32, #tpu.memory_space<vmem>>, vector<1x4x4xf32>
    %84 = vector.shape_cast %83 : vector<1x4x4xf32> to vector<4x4xf32>
    %cst_77 = arith.constant dense<0.000000e+00> : vector<256x4xf32>
    %85 = tpu.matmul %78, %84, %cst_77 {dimension_numbers = #tpu.dot_dimension_numbers<[1], [0], [0], [1], [0, 0, 1, 1], [], []>} : vector<256x4xf32>, vector<4x4xf32>, vector<256x4xf32> -> vector<256x4xf32>
    %86 = arith.addf %68, %85 : vector<256x4xf32>
    %c0_78 = arith.constant 0 : index
    %c2_79 = arith.constant 2 : index
    %c2_80 = arith.constant 2 : index
    %c0_81 = arith.constant 0 : index
    %87 = vector.load %arg2[%c0_78, %c2_79, %c2_80, %c0_81] : memref<1x18x18x4xf32, #tpu.memory_space<vmem>>, vector<1x16x16x4xf32>
    %88 = vector.shape_cast %87 : vector<1x16x16x4xf32> to vector<16x16x4xf32>
    %89 = vector.shape_cast %88 : vector<16x16x4xf32> to vector<256x4xf32>
    %c15 = arith.constant 15 : index
    %c0_82 = arith.constant 0 : index
    %c0_83 = arith.constant 0 : index
    %90 = vector.load %arg3[%c15, %c0_82, %c0_83] : memref<16x4x4xf32, #tpu.memory_space<vmem>>, vector<1x4x4xf32>
    %91 = vector.shape_cast %90 : vector<1x4x4xf32> to vector<4x4xf32>
    %cst_84 = arith.constant dense<0.000000e+00> : vector<256x4xf32>
    %92 = tpu.matmul %89, %91, %cst_84 {dimension_numbers = #tpu.dot_dimension_numbers<[1], [0], [0], [1], [0, 0, 1, 1], [], []>} : vector<256x4xf32>, vector<4x4xf32>, vector<256x4xf32> -> vector<256x4xf32>
    %93 = arith.addf %86, %92 : vector<256x4xf32>
    %94 = vector.shape_cast %45 : vector<256x4xf32> to vector<16x16x4xf32>
    %c0_85 = arith.constant 0 : index
    %c0_86 = arith.constant 0 : index
    %c0_87 = arith.constant 0 : index
    %c0_88 = arith.constant 0 : index
    %c0_89 = arith.constant 0 : index
    %95 = vector.load %arg5[%c0_85, %c0_86, %c0_87, %c0_88, %c0_89] : memref<1x4x16x16x4xf32, #tpu.memory_space<vmem>>, vector<1x1x16x16x4xf32>
    %96 = vector.shape_cast %95 : vector<1x1x16x16x4xf32> to vector<16x16x4xf32>
    %97 = vector.shape_cast %94 : vector<16x16x4xf32> to vector<1x1x16x16x4xf32>
    tpu.vector_store %arg5[%c0_85, %c0_86, %c0_87, %c0_88, %c0_89], %97 {strides = array<i32>} : memref<1x4x16x16x4xf32, #tpu.memory_space<vmem>>, vector<1x1x16x16x4xf32>,
    %98 = vector.shape_cast %64 : vector<256x4xf32> to vector<16x16x4xf32>
    %c0_90 = arith.constant 0 : index
    %c1_91 = arith.constant 1 : index
    %c0_92 = arith.constant 0 : index
    %c0_93 = arith.constant 0 : index
    %c0_94 = arith.constant 0 : index
    %99 = vector.load %arg5[%c0_90, %c1_91, %c0_92, %c0_93, %c0_94] : memref<1x4x16x16x4xf32, #tpu.memory_space<vmem>>, vector<1x1x16x16x4xf32>
    %100 = vector.shape_cast %99 : vector<1x1x16x16x4xf32> to vector<16x16x4xf32>
    %101 = vector.shape_cast %98 : vector<16x16x4xf32> to vector<1x1x16x16x4xf32>
    tpu.vector_store %arg5[%c0_90, %c1_91, %c0_92, %c0_93, %c0_94], %101 {strides = array<i32>} : memref<1x4x16x16x4xf32, #tpu.memory_space<vmem>>, vector<1x1x16x16x4xf32>,
    %102 = vector.shape_cast %82 : vector<256x4xf32> to vector<16x16x4xf32>
    %c0_95 = arith.constant 0 : index
    %c2_96 = arith.constant 2 : index
    %c0_97 = arith.constant 0 : index
    %c0_98 = arith.constant 0 : index
    %c0_99 = arith.constant 0 : index
    %103 = vector.load %arg5[%c0_95, %c2_96, %c0_97, %c0_98, %c0_99] : memref<1x4x16x16x4xf32, #tpu.memory_space<vmem>>, vector<1x1x16x16x4xf32>
    %104 = vector.shape_cast %103 : vector<1x1x16x16x4xf32> to vector<16x16x4xf32>
    %105 = vector.shape_cast %102 : vector<16x16x4xf32> to vector<1x1x16x16x4xf32>
    tpu.vector_store %arg5[%c0_95, %c2_96, %c0_97, %c0_98, %c0_99], %105 {strides = array<i32>} : memref<1x4x16x16x4xf32, #tpu.memory_space<vmem>>, vector<1x1x16x16x4xf32>,
    %106 = vector.shape_cast %93 : vector<256x4xf32> to vector<16x16x4xf32>
    %c0_100 = arith.constant 0 : index
    %c3_101 = arith.constant 3 : index
    %c0_102 = arith.constant 0 : index
    %c0_103 = arith.constant 0 : index
    %c0_104 = arith.constant 0 : index
    %107 = vector.load %arg5[%c0_100, %c3_101, %c0_102, %c0_103, %c0_104] : memref<1x4x16x16x4xf32, #tpu.memory_space<vmem>>, vector<1x1x16x16x4xf32>
    %108 = vector.shape_cast %107 : vector<1x1x16x16x4xf32> to vector<16x16x4xf32>
    %109 = vector.shape_cast %106 : vector<16x16x4xf32> to vector<1x1x16x16x4xf32>
    tpu.vector_store %arg5[%c0_100, %c3_101, %c0_102, %c0_103, %c0_104], %109 {strides = array<i32>} : memref<1x4x16x16x4xf32, #tpu.memory_space<vmem>>, vector<1x1x16x16x4xf32>,
    return
  }
  func.func @transform_0(%arg0: i32, %arg1: i32) -> (i32, i32, i32, i32) {
    %c0_i32 = arith.constant 0 : i32
    %c0_i32_0 = arith.constant 0 : i32
    %c0_i32_1 = arith.constant 0 : i32
    %c0_i32_2 = arith.constant 0 : i32
    return %arg0, %c0_i32, %c0_i32_0, %c0_i32_1 : i32, i32, i32, i32
  }
  func.func @transform_1(%arg0: i32, %arg1: i32) -> (i32, i32, i32) {
    %c0_i32 = arith.constant 0 : i32
    %c0_i32_0 = arith.constant 0 : i32
    %c0_i32_1 = arith.constant 0 : i32
    return %c0_i32, %c0_i32_0, %arg1 : i32, i32, i32
  }
  func.func @transform_2(%arg0: i32, %arg1: i32) -> (i32, i32) {
    %c0_i32 = arith.constant 0 : i32
    %c0_i32_0 = arith.constant 0 : i32
    return %c0_i32, %arg1 : i32, i32
  }
  func.func @transform_3(%arg0: i32, %arg1: i32) -> (i32, i32, i32, i32, i32) {
    %c0_i32 = arith.constant 0 : i32
    %c0_i32_0 = arith.constant 0 : i32
    %c0_i32_1 = arith.constant 0 : i32
    %c0_i32_2 = arith.constant 0 : i32
    return %arg0, %c0_i32, %c0_i32_0, %c0_i32_1, %arg1 : i32, i32, i32, i32, i32
  }
}

</mosaic_0001>

<bundles_post_ra>
// kernel: _lambda_.1
= control target key start
LH: loop header
LB: loop body
LE: loop exit
PB: predicated region body
PF: predicated region fallthrough
CT: control target
= control target key end

     0   :  { %s8567_s12 = smov 0   ;;  %s8569_s13 = smov 0   ;;  %s10520_s0 = inlined_call_operand.vmem [shape: f32[2,18,18,4], index: 0, kind: input, shape index: {}]   ;;  %s10521_s1 = inlined_call_operand.vmem [shape: f32[16,4,4], index: 1, kind: input, shape index: {}]   ;;  %s10522_s2 = inlined_call_operand.vmem [shape: f32[1,4], index: 2, kind: input, shape index: {}]   ;;  %s10523_s3 = inlined_call_operand.vmem [shape: f32[2,4,16,16,4], index: 3, kind: output, shape index: {}]  }
   0x1   :  { %s8571_s14 = smov 0  }
   0x2 LB: > { %s25_s15 = sadd.s32 1, %s8541_s13  ;;  %p5818_p0 = scmp.ge.s32.totalorder %s8545_s14, 1  ;;  %s8545_s14 = sphi %s8571_s14, %s13_s14   ;;  %s8541_s13 = sphi %s8569_s13, %s10645_s13   ;;  %s8537_s12 = sphi %s8567_s12, %s10644_s12  }
   0x3   : > { %p27_p1 = scmp.ge.s32.totalorder %s25_s15, 2  ;;  %p168_p2 = scmp.lt.s32.totalorder %s8545_s14, 3 }
   0x5   : > { %s10647_s15 = smov (%p27_p1, %s25_s15), 0  ;;  %p169_p3 = pnand %p5818_p0, %p168_p2 }
   0x7   : > { %172 = sbr.rel (%p169_p3) target bundleno = 747 (0x2eb), region = 32 }
   0xe   : > { %v261_v0 = vld [vmem:[%s10521_s1] sm:$0xf]  ;;  %vm359_vm0 = vcmask 1043456   ;;  %v5890_v1 = vld [vmem:[%s10521_s1 + $0x8] sm:$0xf]  ;;  %p202_p4 = scmp.lt.s32.totalorder %s8537_s12, 1 }
   0xf   : > { %7185 = vmatprep.subr.msk.mxu0 %vm359_vm0, %v261_v0  ;;  %7285 = vmatprep.subr.msk.mxu1 %vm359_vm0, %v5890_v1  ;;  %v5856_v2 = vld [vmem:[%s10521_s1 + $0x4] sm:$0xf]  ;;  %v5924_v3 = vld [vmem:[%s10521_s1 + $0xc] sm:$0xf]  ;;  %vm262_vm1 = vcmask 31744  }
  0x10   : > { %7186 = vmatpush3.msk.msra.mxu0 %vm359_vm0, %v261_v0  ;;  %7286 = vmatpush3.msk.msra.mxu1 %vm359_vm0, %v5890_v1  ;;  %s10649_s12 = smov (!%p202_p4, %s8537_s12), 1  ;;  %v8634_v10 = vld [vmem:[%s10521_s1 + $0x10] sm:$0xf]  ;;  %v8639_v11 = vld [vmem:[%s10521_s1 + $0x14] sm:$0xf] }
  0x11   : > { %7235 = vmatprep.subr.msk.mxu0 %vm359_vm0, %v5856_v2  ;;  %7335 = vmatprep.subr.msk.mxu1 %vm359_vm0, %v5924_v3  ;;  %s8497_s24 = smul.u32 432, %s10649_s12  ;;  %s6656_s30 = sshll.u32 %s10649_s12, 10 }
  0x12   : > { %s9877_s7 = scalar_lea.vmem %s10523_s3, %s6656_s30 }
  0x13   : > { %s8609_s27 = scalar_lea.vmem %s10520_s0, %s8497_s24 }
  0x14   : > { %v229_v4 = vld [vmem:[%s8609_s27] sm:$0xff]  ;;  %v230_v6 = vld [vmem:[%s8609_s27 + $0x8] sm:$0xff]  ;;  %v8623_v8 = vld [vmem:[%s8609_s27 + $0x18] sm:$0xff] }
  0x15   : > { %v8613_v5 = vld [vmem:[%s8609_s27 + $0x1] sm:$0xff]  ;;  %7187 = vmatprep.mubr.msk.f32.mxu0 %vm262_vm1, %v229_v4  ;;  %v8620_v7 = vld [vmem:[%s8609_s27 + $0x9] sm:$0xff]  ;;  %v8626_v9 = vld [vmem:[%s8609_s27 + $0x19] sm:$0xff] }
  0x16   : > { %7287 = vmatprep.mubr.msk.f32.mxu1 %vm262_vm1, %v8613_v5  ;;  %7188 = vmatmul.mubr.msk.f32.vlgmr.msra.gmra.mrb[0].mxu0 %vm262_vm1, %v230_v6  ;;  %v8644_v12 = vld [vmem:[%s8609_s27 + $0x20] sm:$0xff]  ;;  %v8654_v14 = vld [vmem:[%s8609_s27 + $0x30] sm:$0xff]  ;;  %v8672_v16 = vld [vmem:[%s8609_s27 + $0x38] sm:$0xff] }
  0x17   : > { %7288 = vmatmul.mubr.msk.f32.vlgmr.msra.gmra.mrb[0].mxu1 %vm262_vm1, %v8620_v7  ;;  %7236 = vmatpush3.msk.msra.mxu0 %vm359_vm0, %v5856_v2  ;;  %v8647_v13 = vld [vmem:[%s8609_s27 + $0x21] sm:$0xff]  ;;  %v8657_v15 = vld [vmem:[%s8609_s27 + $0x31] sm:$0xff]  ;;  %v8675_v17 = vld [vmem:[%s8609_s27 + $0x39] sm:$0xff] }
  0x18   : > { %7336 = vmatpush3.msk.msra.mxu1 %vm359_vm0, %v5924_v3  ;;  %7190 = vmatprep.mubr.msk.f32.mxu0 %vm262_vm1, %v8623_v8  ;;  %v8678_v18 = vld [vmem:[%s8609_s27 + $0x48] sm:$0xff]  ;;  %v8692_v20 = vld [vmem:[%s8609_s27 + $0x50] sm:$0xff]  ;;  %v8698_v22 = vld [vmem:[%s8609_s27 + $0x60] sm:$0xff] }
  0x19   : > { %7290 = vmatprep.mubr.msk.f32.mxu1 %vm262_vm1, %v8626_v9  ;;  %7385 = vmatprep.subr.msk.mxu0 %vm359_vm0, %v8634_v10  ;;  %v8681_v19 = vld [vmem:[%s8609_s27 + $0x49] sm:$0xff]  ;;  %v8695_v21 = vld [vmem:[%s8609_s27 + $0x51] sm:$0xff]  ;;  %v8701_v23 = vld [vmem:[%s8609_s27 + $0x61] sm:$0xff] }
  0x1a   : > { %7435 = vmatprep.subr.msk.mxu1 %vm359_vm0, %v8639_v11  ;;  %7191 = vmatmul.mubr.msk.f32.gmra.mrb[2].mxu0 %vm262_vm1, %v8644_v12  ;;  %v8712_v24 = vld [vmem:[%s8609_s27 + $0x68] sm:$0xff]  ;;  %v8718_v26 = vld [vmem:[%s8609_s27 + $0x78] sm:$0xff]  ;;  %v8732_v28 = vld [vmem:[%s8609_s27 + $0x80] sm:$0xff] }
  0x1b   : > { %7291 = vmatmul.mubr.msk.f32.gmra.mrb[2].mxu1 %vm262_vm1, %v8647_v13  ;;  %7193 = vmatprep.mubr.msk.f32.mxu0 %vm262_vm1, %v8654_v14  ;;  %v8715_v25 = vld [vmem:[%s8609_s27 + $0x69] sm:$0xff]  ;;  %v8721_v27 = vld [vmem:[%s8609_s27 + $0x79] sm:$0xff]  ;;  %v8735_v29 = vld [vmem:[%s8609_s27 + $0x81] sm:$0xff] }
  0x1c   : > { %7293 = vmatprep.mubr.msk.f32.mxu1 %vm262_vm1, %v8657_v15  ;;  %v8738_v30 = vld [vmem:[%s8609_s27 + $0x90] sm:$0xff]  ;;  %v8752_v32 = vld [vmem:[%s8609_s27 + $0x98] sm:$0xff]  ;;  %v8758_v34 = vld [vmem:[%s8609_s27 + $0xa8] sm:$0xff] }
  0x1d   : > { %v8741_v31 = vld [vmem:[%s8609_s27 + $0x91] sm:$0xff]  ;;  %v8755_v33 = vld [vmem:[%s8609_s27 + $0x99] sm:$0xff]  ;;  %v8761_v35 = vld [vmem:[%s8609_s27 + $0xa9] sm:$0xff] }
  0x1e   : > { %7194 = vmatmul.mubr.msk.f32.gmra.mrb[4].mxu0 %vm262_vm1, %v8672_v16  ;;  %v8772_v36 = vld [vmem:[%s8609_s27 + $0xb0] sm:$0xff]  ;;  %v8778_v38 = vld [vmem:[%s8609_s27 + $0xc0] sm:$0xff]  ;;  %v8792_v40 = vld [vmem:[%s8609_s27 + $0xc8] sm:$0xff] }
  0x1f   : > { %7294 = vmatmul.mubr.msk.f32.gmra.mrb[4].mxu1 %vm262_vm1, %v8675_v17  ;;  %7196 = vmatprep.mubr.msk.f32.mxu0 %vm262_vm1, %v8678_v18  ;;  %v8775_v37 = vld [vmem:[%s8609_s27 + $0xb1] sm:$0xff]  ;;  %v8781_v39 = vld [vmem:[%s8609_s27 + $0xc1] sm:$0xff]  ;;  %v8795_v41 = vld [vmem:[%s8609_s27 + $0xc9] sm:$0xff] }
  0x20   : > { %7296 = vmatprep.mubr.msk.f32.mxu1 %vm262_vm1, %v8681_v19  ;;  %v8798_v42 = vld [vmem:[%s8609_s27 + $0xd8] sm:$0xff]  ;;  %v8812_v44 = vld [vmem:[%s8609_s27 + $0xe0] sm:$0xff]  ;;  %v8818_v46 = vld [vmem:[%s8609_s27 + $0xf0] sm:$0xff] }
  0x21   : > { %v8801_v43 = vld [vmem:[%s8609_s27 + $0xd9] sm:$0xff]  ;;  %v8815_v45 = vld [vmem:[%s8609_s27 + $0xe1] sm:$0xff]  ;;  %v8821_v47 = vld [vmem:[%s8609_s27 + $0xf1] sm:$0xff] }
  0x22   : > { %7197 = vmatmul.mubr.msk.f32.gmra.mrb[6].mxu0 %vm262_vm1, %v8692_v20  ;;  %v8832_v48 = vld [vmem:[%s8609_s27 + $0xf8] sm:$0xff]  ;;  %v8838_v50 = vld [vmem:[%s8609_s27 + $0x108] sm:$0xff]  ;;  %v8852_v52 = vld [vmem:[%s8609_s27 + $0x110] sm:$0xff] }
  0x23   : > { %7297 = vmatmul.mubr.msk.f32.gmra.mrb[6].mxu1 %vm262_vm1, %v8695_v21  ;;  %7199 = vmatprep.mubr.msk.f32.mxu0 %vm262_vm1, %v8698_v22  ;;  %v8835_v49 = vld [vmem:[%s8609_s27 + $0xf9] sm:$0xff]  ;;  %v8841_v51 = vld [vmem:[%s8609_s27 + $0x109] sm:$0xff]  ;;  %v8855_v53 = vld [vmem:[%s8609_s27 + $0x111] sm:$0xff] }
  0x24   : > { %7299 = vmatprep.mubr.msk.f32.mxu1 %vm262_vm1, %v8701_v23  ;;  %v8858_v54 = vld [vmem:[%s8609_s27 + $0x120] sm:$0xff]  ;;  %v8872_v56 = vld [vmem:[%s8609_s27 + $0x128] sm:$0xff]  ;;  %v8878_v58 = vld [vmem:[%s8609_s27 + $0x138] sm:$0xff] }
  0x25   : > { %v8861_v55 = vld [vmem:[%s8609_s27 + $0x121] sm:$0xff]  ;;  %v8875_v57 = vld [vmem:[%s8609_s27 + $0x129] sm:$0xff]  ;;  %v8881_v59 = vld [vmem:[%s8609_s27 + $0x139] sm:$0xff] }
  0x26   : > { %7200 = vmatmul.mubr.msk.f32.gmra.mrb[8].mxu0 %vm262_vm1, %v8712_v24  ;;  %v8892_v60 = vld [vmem:[%s8609_s27 + $0x140] sm:$0xff]  ;;  %v8898_v62 = vld [vmem:[%s8609_s27 + $0x150] sm:$0xff]  ;;  %v8912_v0 = vld [vmem:[%s8609_s27 + $0x158] sm:$0xff] }
  0x27   : > { %7300 = vmatmul.mubr.msk.f32.gmra.mrb[8].mxu1 %vm262_vm1, %v8715_v25  ;;  %7202 = vmatprep.mubr.msk.f32.mxu0 %vm262_vm1, %v8718_v26  ;;  %v8895_v61 = vld [vmem:[%s8609_s27 + $0x141] sm:$0xff]  ;;  %10584 = vst [vmem:[#allocation2_spill] sm:$0xff] %v8898_v62  ;;  %v8901_v63 = vld [vmem:[%s8609_s27 + $0x151] sm:$0xff]  ;;  %10585 = vst [vmem:[#allocation3_spill] sm:$0xff] %v8912_v0 }
  0x28   : > { %7302 = vmatprep.mubr.msk.f32.mxu1 %vm262_vm1, %v8721_v27  ;;  %v8915_v1 = vld [vmem:[%s8609_s27 + $0x159] sm:$0xff]  ;;  %v8918_v2 = vld [vmem:[%s8609_s27 + $0x168] sm:$0xff]  ;;  %v8932_v4 = vld [vmem:[%s8609_s27 + $0x170] sm:$0xff] }
  0x29   : > { %10586 = vst [vmem:[#allocation4_spill] sm:$0xff] %v8918_v2  ;;  %v8921_v3 = vld [vmem:[%s8609_s27 + $0x169] sm:$0xff]  ;;  %10587 = vst [vmem:[#allocation5_spill] sm:$0xff] %v8932_v4  ;;  %v8935_v6 = vld [vmem:[%s8609_s27 + $0x171] sm:$0xff] }
  0x2a   : > { %7203 = vmatmul.mubr.msk.f32.gmra.mrb[10].mxu0 %vm262_vm1, %v8732_v28 }
  0x2b   : > { %7303 = vmatmul.mubr.msk.f32.gmra.mrb[10].mxu1 %vm262_vm1, %v8735_v29  ;;  %7205 = vmatprep.mubr.msk.f32.mxu0 %vm262_vm1, %v8738_v30 }
  0x2c   : > { %7305 = vmatprep.mubr.msk.f32.mxu1 %vm262_vm1, %v8741_v31 }
  0x2e   : > { %7206 = vmatmul.mubr.msk.f32.gmra.mrb[12].mxu0 %vm262_vm1, %v8752_v32 }
  0x2f   : > { %7306 = vmatmul.mubr.msk.f32.gmra.mrb[12].mxu1 %vm262_vm1, %v8755_v33  ;;  %7208 = vmatprep.mubr.msk.f32.mxu0 %vm262_vm1, %v8758_v34 }
  0x30   : > { %7308 = vmatprep.mubr.msk.f32.mxu1 %vm262_vm1, %v8761_v35 }
  0x32   : > { %7209 = vmatmul.mubr.msk.f32.gmra.mrb[14].mxu0 %vm262_vm1, %v8772_v36 }
  0x33   : > { %7309 = vmatmul.mubr.msk.f32.gmra.mrb[14].mxu1 %vm262_vm1, %v8775_v37  ;;  %7211 = vmatprep.mubr.msk.f32.mxu0 %vm262_vm1, %v8778_v38 }
  0x34   : > { %7311 = vmatprep.mubr.msk.f32.mxu1 %vm262_vm1, %v8781_v39 }
  0x36   : > { %7212 = vmatmul.mubr.msk.f32.gmra.mrb[16].mxu0 %vm262_vm1, %v8792_v40 }
  0x37   : > { %7312 = vmatmul.mubr.msk.f32.gmra.mrb[16].mxu1 %vm262_vm1, %v8795_v41  ;;  %7214 = vmatprep.mubr.msk.f32.mxu0 %vm262_vm1, %v8798_v42 }
  0x38   : > { %7314 = vmatprep.mubr.msk.f32.mxu1 %vm262_vm1, %v8801_v43 }
  0x3a   : > { %7215 = vmatmul.mubr.msk.f32.gmra.mrb[18].mxu0 %vm262_vm1, %v8812_v44 }
  0x3b   : > { %7315 = vmatmul.mubr.msk.f32.gmra.mrb[18].mxu1 %vm262_vm1, %v8815_v45  ;;  %7217 = vmatprep.mubr.msk.f32.mxu0 %vm262_vm1, %v8818_v46 }
  0x3c   : > { %7317 = vmatprep.mubr.msk.f32.mxu1 %vm262_vm1, %v8821_v47 }
  0x3e   : > { %7218 = vmatmul.mubr.msk.f32.gmra.mrb[20].mxu0 %vm262_vm1, %v8832_v48 }
  0x3f   : > { %7318 = vmatmul.mubr.msk.f32.gmra.mrb[20].mxu1 %vm262_vm1, %v8835_v49  ;;  %7220 = vmatprep.mubr.msk.f32.mxu0 %vm262_vm1, %v8838_v50 }
  0x40   : > { %7320 = vmatprep.mubr.msk.f32.mxu1 %vm262_vm1, %v8841_v51 }
  0x42   : > { %7221 = vmatmul.mubr.msk.f32.gmra.mrb[22].mxu0 %vm262_vm1, %v8852_v52 }
  0x43   : > { %7321 = vmatmul.mubr.msk.f32.gmra.mrb[22].mxu1 %vm262_vm1, %v8855_v53  ;;  %7223 = vmatprep.mubr.msk.f32.mxu0 %vm262_vm1, %v8858_v54 }
  0x44   : > { %7323 = vmatprep.mubr.msk.f32.mxu1 %vm262_vm1, %v8861_v55 }
  0x46   : > { %7224 = vmatmul.mubr.msk.f32.gmra.mrb[24].mxu0 %vm262_vm1, %v8872_v56 }
  0x47   : > { %7324 = vmatmul.mubr.msk.f32.gmra.mrb[24].mxu1 %vm262_vm1, %v8875_v57  ;;  %7226 = vmatprep.mubr.msk.f32.mxu0 %vm262_vm1, %v8878_v58 }
  0x48   : > { %7326 = vmatprep.mubr.msk.f32.mxu1 %vm262_vm1, %v8881_v59 }
  0x4a   : > { %7227 = vmatmul.mubr.msk.f32.gmra.mrb[26].mxu0 %vm262_vm1, %v8892_v60 }
  0x4b   : > { %7327 = vmatmul.mubr.msk.f32.gmra.mrb[26].mxu1 %vm262_vm1, %v8895_v61  ;;  %7229 = vmatprep.mubr.msk.f32.mxu0 %vm262_vm1, %v8898_v62  ;;  %v1272_v62 = vld [vmem:[%s8609_s27 + $0x2] sm:$0xff] }
  0x4c   : > { %7329 = vmatprep.mubr.msk.f32.mxu1 %vm262_vm1, %v8901_v63 }
  0x4e   : > { %7230 = vmatmul.mubr.msk.f32.gmra.mrb[28].mxu0 %vm262_vm1, %v8912_v0  ;;  %v8947_v0 = vld [vmem:[%s8609_s27 + $0x1a] sm:$0xff] }
  0x4f   : > { %7330 = vmatmul.mubr.msk.f32.gmra.mrb[28].mxu1 %vm262_vm1, %v8915_v1  ;;  %7232 = vmatprep.mubr.msk.f32.mxu0 %vm262_vm1, %v8918_v2  ;;  %v1273_v2 = vld [vmem:[%s8609_s27 + $0xa] sm:$0xff] }
  0x50   : > { %7332 = vmatprep.mubr.msk.f32.mxu1 %vm262_vm1, %v8921_v3 }
  0x52   : > { %7233 = vmatmul.mubr.msk.f32.gmra.mrb[30].mxu0 %vm262_vm1, %v8932_v4  ;;  %v8955_v4 = vld [vmem:[%s10521_s1 + $0x18] sm:$0xf] }
  0x53   : > { %7333 = vmatmul.mubr.msk.f32.gmra.mrb[30].mxu1 %vm262_vm1, %v8935_v6  ;;  %7237 = vmatprep.mubr.msk.f32.mxu0 %vm262_vm1, %v8613_v5  ;;  %v8960_v5 = vld [vmem:[%s10521_s1 + $0x1c] sm:$0xf] }
  0x54   : > { %7337 = vmatprep.mubr.msk.f32.mxu1 %vm262_vm1, %v1272_v62  ;;  %v8974_v62 = vld [vmem:[%s8609_s27 + $0x32] sm:$0xff] }
  0x55   : > { %10589 = vst [vmem:[#allocation7_spill] sm:$0xff] %v8974_v62 }
  0x56   : > { %7238 = vmatmul.mubr.msk.f32.vlgmr.msra.gmra.mrb[0].mxu0 %vm262_vm1, %v8620_v7  ;;  %v8967_v7 = vld [vmem:[%s8609_s27 + $0x22] sm:$0xff] }
  0x57   : > { %7338 = vmatmul.mubr.msk.f32.vlgmr.msra.gmra.mrb[0].mxu1 %vm262_vm1, %v1273_v2  ;;  %7386 = vmatpush3.msk.msra.mxu0 %vm359_vm0, %v8634_v10  ;;  %10588 = vst [vmem:[#allocation6_spill] sm:$0xff] %v8967_v7  ;;  %v8989_v10 = vld [vmem:[%s8609_s27 + $0x3a] sm:$0xff]  ;;  %v9003_v2 = vld [vmem:[%s8609_s27 + $0x52] sm:$0xff] }
  0x58   : > { %7436 = vmatpush3.msk.msra.mxu1 %vm359_vm0, %v8639_v11  ;;  %7240 = vmatprep.mubr.msk.f32.mxu0 %vm262_vm1, %v8626_v9  ;;  %10590 = vst [vmem:[#allocation8_spill] sm:$0xff] %v8989_v10  ;;  %v8992_v11 = vld [vmem:[%s8609_s27 + $0x4a] sm:$0xff]  ;;  %10592 = vst [vmem:[#allocation10_spill] sm:$0xff] %v9003_v2 }
  0x59   : > { %7340 = vmatprep.mubr.msk.f32.mxu1 %vm262_vm1, %v8947_v0  ;;  %7485 = vmatprep.subr.msk.mxu0 %vm359_vm0, %v8955_v4  ;;  %10591 = vst [vmem:[#allocation9_spill] sm:$0xff] %v8992_v11 }
  0x5a   : > { %7535 = vmatprep.subr.msk.mxu1 %vm359_vm0, %v8960_v5  ;;  %7241 = vmatmul.mubr.msk.f32.gmra.mrb[2].mxu0 %vm262_vm1, %v8647_v13 }
  0x5b   : > { %7341 = vmatmul.mubr.msk.f32.gmra.mrb[2].mxu1 %vm262_vm1, %v8967_v7  ;;  %7243 = vmatprep.mubr.msk.f32.mxu0 %vm262_vm1, %v8657_v15  ;;  %v9160_v7 = vld [vmem:[%s8609_s27 + $0x16a] sm:$0xff] }
  0x5c   : > { %7343 = vmatprep.mubr.msk.f32.mxu1 %vm262_vm1, %v8974_v62  ;;  %v9006_v62 = vld [vmem:[%s8609_s27 + $0x62] sm:$0xff]  ;;  %10612 = vst [vmem:[#allocation30_spill] sm:$0xff] %v9160_v7 }
  0x5d   : > { %10593 = vst [vmem:[#allocation11_spill] sm:$0xff] %v9006_v62 }
  0x5e   : > { %7244 = vmatmul.mubr.msk.f32.gmra.mrb[4].mxu0 %vm262_vm1, %v8675_v17 }
  0x5f   : > { %7344 = vmatmul.mubr.msk.f32.gmra.mrb[4].mxu1 %vm262_vm1, %v8989_v10  ;;  %7246 = vmatprep.mubr.msk.f32.mxu0 %vm262_vm1, %v8681_v19  ;;  %v9017_v10 = vld [vmem:[%s8609_s27 + $0x6a] sm:$0xff] }
  0x60   : > { %7346 = vmatprep.mubr.msk.f32.mxu1 %vm262_vm1, %v8992_v11  ;;  %10594 = vst [vmem:[#allocation12_spill] sm:$0xff] %v9017_v10  ;;  %v9020_v11 = vld [vmem:[%s8609_s27 + $0x7a] sm:$0xff] }
  0x61   : > { %10595 = vst [vmem:[#allocation13_spill] sm:$0xff] %v9020_v11 }
  0x62   : > { %7247 = vmatmul.mubr.msk.f32.gmra.mrb[6].mxu0 %vm262_vm1, %v8695_v21 }
  0x63   : > { %7347 = vmatmul.mubr.msk.f32.gmra.mrb[6].mxu1 %vm262_vm1, %v9003_v2  ;;  %7249 = vmatprep.mubr.msk.f32.mxu0 %vm262_vm1, %v8701_v23  ;;  %v9031_v2 = vld [vmem:[%s8609_s27 + $0x82] sm:$0xff] }
  0x64   : > { %7349 = vmatprep.mubr.msk.f32.mxu1 %vm262_vm1, %v9006_v62  ;;  %10596 = vst [vmem:[#allocation14_spill] sm:$0xff] %v9031_v2  ;;  %v9034_v62 = vld [vmem:[%s8609_s27 + $0x92] sm:$0xff] }
  0x65   : > { %10597 = vst [vmem:[#allocation15_spill] sm:$0xff] %v9034_v62 }
  0x66   : > { %7250 = vmatmul.mubr.msk.f32.gmra.mrb[8].mxu0 %vm262_vm1, %v8715_v25 }
  0x67   : > { %7350 = vmatmul.mubr.msk.f32.gmra.mrb[8].mxu1 %vm262_vm1, %v9017_v10  ;;  %7252 = vmatprep.mubr.msk.f32.mxu0 %vm262_vm1, %v8721_v27  ;;  %v9045_v10 = vld [vmem:[%s8609_s27 + $0x9a] sm:$0xff] }
  0x68   : > { %7352 = vmatprep.mubr.msk.f32.mxu1 %vm262_vm1, %v9020_v11  ;;  %10598 = vst [vmem:[#allocation16_spill] sm:$0xff] %v9045_v10  ;;  %v9048_v11 = vld [vmem:[%s8609_s27 + $0xaa] sm:$0xff] }
  0x69   : > { %10599 = vst [vmem:[#allocation17_spill] sm:$0xff] %v9048_v11 }
  0x6a   : > { %7253 = vmatmul.mubr.msk.f32.gmra.mrb[10].mxu0 %vm262_vm1, %v8735_v29 }
  0x6b   : > { %7353 = vmatmul.mubr.msk.f32.gmra.mrb[10].mxu1 %vm262_vm1, %v9031_v2  ;;  %7255 = vmatprep.mubr.msk.f32.mxu0 %vm262_vm1, %v8741_v31  ;;  %v9059_v2 = vld [vmem:[%s8609_s27 + $0xb2] sm:$0xff] }
  0x6c   : > { %7355 = vmatprep.mubr.msk.f32.mxu1 %vm262_vm1, %v9034_v62  ;;  %10600 = vst [vmem:[#allocation18_spill] sm:$0xff] %v9059_v2  ;;  %v9062_v62 = vld [vmem:[%s8609_s27 + $0xc2] sm:$0xff] }
  0x6d   : > { %10601 = vst [vmem:[#allocation19_spill] sm:$0xff] %v9062_v62 }
  0x6e   : > { %7256 = vmatmul.mubr.msk.f32.gmra.mrb[12].mxu0 %vm262_vm1, %v8755_v33 }
  0x6f   : > { %7356 = vmatmul.mubr.msk.f32.gmra.mrb[12].mxu1 %vm262_vm1, %v9045_v10  ;;  %7258 = vmatprep.mubr.msk.f32.mxu0 %vm262_vm1, %v8761_v35  ;;  %v9073_v10 = vld [vmem:[%s8609_s27 + $0xca] sm:$0xff] }
  0x70   : > { %7358 = vmatprep.mubr.msk.f32.mxu1 %vm262_vm1, %v9048_v11  ;;  %10602 = vst [vmem:[#allocation20_spill] sm:$0xff] %v9073_v10  ;;  %v9076_v11 = vld [vmem:[%s8609_s27 + $0xda] sm:$0xff] }
  0x71   : > { %10603 = vst [vmem:[#allocation21_spill] sm:$0xff] %v9076_v11 }
  0x72   : > { %7259 = vmatmul.mubr.msk.f32.gmra.mrb[14].mxu0 %vm262_vm1, %v8775_v37 }
  0x73   : > { %7359 = vmatmul.mubr.msk.f32.gmra.mrb[14].mxu1 %vm262_vm1, %v9059_v2  ;;  %7261 = vmatprep.mubr.msk.f32.mxu0 %vm262_vm1, %v8781_v39  ;;  %v9087_v2 = vld [vmem:[%s8609_s27 + $0xe2] sm:$0xff] }
  0x74   : > { %7361 = vmatprep.mubr.msk.f32.mxu1 %vm262_vm1, %v9062_v62  ;;  %10604 = vst [vmem:[#allocation22_spill] sm:$0xff] %v9087_v2  ;;  %v9090_v62 = vld [vmem:[%s8609_s27 + $0xf2] sm:$0xff] }
  0x75   : > { %10605 = vst [vmem:[#allocation23_spill] sm:$0xff] %v9090_v62 }
  0x76   : > { %7262 = vmatmul.mubr.msk.f32.gmra.mrb[16].mxu0 %vm262_vm1, %v8795_v41 }
  0x77   : > { %7362 = vmatmul.mubr.msk.f32.gmra.mrb[16].mxu1 %vm262_vm1, %v9073_v10  ;;  %7264 = vmatprep.mubr.msk.f32.mxu0 %vm262_vm1, %v8801_v43  ;;  %v9101_v10 = vld [vmem:[%s8609_s27 + $0xfa] sm:$0xff] }
  0x78   : > { %7364 = vmatprep.mubr.msk.f32.mxu1 %vm262_vm1, %v9076_v11  ;;  %10606 = vst [vmem:[#allocation24_spill] sm:$0xff] %v9101_v10  ;;  %v9104_v11 = vld [vmem:[%s8609_s27 + $0x10a] sm:$0xff] }
  0x79   : > { %10607 = vst [vmem:[#allocation25_spill] sm:$0xff] %v9104_v11 }
  0x7a   : > { %7265 = vmatmul.mubr.msk.f32.gmra.mrb[18].mxu0 %vm262_vm1, %v8815_v45 }
  0x7b   : > { %7365 = vmatmul.mubr.msk.f32.gmra.mrb[18].mxu1 %vm262_vm1, %v9087_v2  ;;  %7267 = vmatprep.mubr.msk.f32.mxu0 %vm262_vm1, %v8821_v47  ;;  %v9115_v2 = vld [vmem:[%s8609_s27 + $0x112] sm:$0xff] }
  0x7c   : > { %7367 = vmatprep.mubr.msk.f32.mxu1 %vm262_vm1, %v9090_v62  ;;  %10608 = vst [vmem:[#allocation26_spill] sm:$0xff] %v9115_v2  ;;  %v9118_v62 = vld [vmem:[%s8609_s27 + $0x122] sm:$0xff] }
  0x7d   : > { %10609 = vst [vmem:[#allocation27_spill] sm:$0xff] %v9118_v62 }
  0x7e   : > { %7268 = vmatmul.mubr.msk.f32.gmra.mrb[20].mxu0 %vm262_vm1, %v8835_v49 }
  0x7f   : > { %7368 = vmatmul.mubr.msk.f32.gmra.mrb[20].mxu1 %vm262_vm1, %v9101_v10  ;;  %7270 = vmatprep.mubr.msk.f32.mxu0 %vm262_vm1, %v8841_v51  ;;  %v9129_v10 = vld [vmem:[%s8609_s27 + $0x12a] sm:$0xff] }
  0x80   : > { %7370 = vmatprep.mubr.msk.f32.mxu1 %vm262_vm1, %v9104_v11  ;;  %10610 = vst [vmem:[#allocation28_spill] sm:$0xff] %v9129_v10  ;;  %v9132_v11 = vld [vmem:[%s8609_s27 + $0x13a] sm:$0xff] }
  0x82   : > { %7271 = vmatmul.mubr.msk.f32.gmra.mrb[22].mxu0 %vm262_vm1, %v8855_v53 }
  0x83   : > { %7371 = vmatmul.mubr.msk.f32.gmra.mrb[22].mxu1 %vm262_vm1, %v9115_v2  ;;  %7273 = vmatprep.mubr.msk.f32.mxu0 %vm262_vm1, %v8861_v55  ;;  %v9143_v2 = vld [vmem:[%s8609_s27 + $0x142] sm:$0xff] }
  0x84   : > { %7373 = vmatprep.mubr.msk.f32.mxu1 %vm262_vm1, %v9118_v62  ;;  %10611 = vst [vmem:[#allocation29_spill] sm:$0xff] %v9143_v2  ;;  %v9146_v62 = vld [vmem:[%s8609_s27 + $0x152] sm:$0xff] }
  0x86   : > { %7274 = vmatmul.mubr.msk.f32.gmra.mrb[24].mxu0 %vm262_vm1, %v8875_v57 }
  0x87   : > { %7374 = vmatmul.mubr.msk.f32.gmra.mrb[24].mxu1 %vm262_vm1, %v9129_v10  ;;  %7276 = vmatprep.mubr.msk.f32.mxu0 %vm262_vm1, %v8881_v59  ;;  %v9157_v10 = vld [vmem:[%s8609_s27 + $0x15a] sm:$0xff] }
  0x88   : > { %7376 = vmatprep.mubr.msk.f32.mxu1 %vm262_vm1, %v9132_v11 }
  0x8a   : > { %7277 = vmatmul.mubr.msk.f32.gmra.mrb[26].mxu0 %vm262_vm1, %v8895_v61 }
  0x8b   : > { %7377 = vmatmul.mubr.msk.f32.gmra.mrb[26].mxu1 %vm262_vm1, %v9143_v2  ;;  %7279 = vmatprep.mubr.msk.f32.mxu0 %vm262_vm1, %v8901_v63  ;;  %v9171_v2 = vld [vmem:[%s8609_s27 + $0x172] sm:$0xff] }
  0x8c   : > { %7379 = vmatprep.mubr.msk.f32.mxu1 %vm262_vm1, %v9146_v62  ;;  %10613 = vst [vmem:[#allocation31_spill] sm:$0xff] %v9171_v2 }
  0x8e   : > { %7280 = vmatmul.mubr.msk.f32.gmra.mrb[28].mxu0 %vm262_vm1, %v8915_v1 }
  0x8f   : > { %7380 = vmatmul.mubr.msk.f32.gmra.mrb[28].mxu1 %vm262_vm1, %v9157_v10  ;;  %7282 = vmatprep.mubr.msk.f32.mxu0 %vm262_vm1, %v8921_v3 }
  0x90   : > { %7382 = vmatprep.mubr.msk.f32.mxu1 %vm262_vm1, %v9160_v7  ;;  %v9188_v7 = vld [vmem:[%s10521_s1 + $0x20] sm:$0xf] }
  0x92   : > { %7283 = vmatmul.mubr.msk.f32.gmra.mrb[30].mxu0 %vm262_vm1, %v8935_v6 }
  0x93   : > { %7383 = vmatmul.mubr.msk.f32.gmra.mrb[30].mxu1 %vm262_vm1, %v9171_v2  ;;  %7387 = vmatprep.mubr.msk.f32.mxu0 %vm262_vm1, %v8623_v8  ;;  %v9193_v2 = vld [vmem:[%s10521_s1 + $0x24] sm:$0xf] }
  0x94   : > { %7437 = vmatprep.mubr.msk.f32.mxu1 %vm262_vm1, %v8623_v8  ;;  %v10614_v8 = vld [vmem:[#allocation2_spill] sm:$0xff] }
  0x96   : > { %7388 = vmatmul.mubr.msk.f32.vlgmr.msra.gmra.mrb[0].mxu0 %vm262_vm1, %v8644_v12 }
  0x97   : > { %7438 = vmatmul.mubr.msk.f32.vlgmr.msra.gmra.mrb[32].mxu1 %vm262_vm1, %v8644_v12  ;;  %7486 = vmatpush3.msk.msra.mxu0 %vm359_vm0, %v8955_v4  ;;  %v10615_v12 = vld [vmem:[#allocation3_spill] sm:$0xff]  ;;  %v6333_v4 = vld [vmem:[%s8609_s27 + $0x80] sm:$0xff] }
  0x98   : > { %7536 = vmatpush3.msk.msra.mxu1 %vm359_vm0, %v8960_v5  ;;  %7390 = vmatprep.mubr.msk.f32.mxu0 %vm262_vm1, %v8654_v14  ;;  %v6334_v5 = vld [vmem:[%s8609_s27 + $0x90] sm:$0xff] }
  0x99   : > { %7440 = vmatprep.mubr.msk.f32.mxu1 %vm262_vm1, %v8654_v14  ;;  %7585 = vmatprep.subr.msk.mxu1 %vm359_vm0, %v9188_v7  ;;  %v10616_v14 = vld [vmem:[#allocation4_spill] sm:$0xff] }
  0x9a   : > { %7635 = vmatprep.subr.msk.mxu0 %vm359_vm0, %v9193_v2  ;;  %7391 = vmatmul.mubr.msk.f32.gmra.mrb[2].mxu0 %vm262_vm1, %v8672_v16 }
  0x9b   : > { %7441 = vmatmul.mubr.msk.f32.gmra.mrb[34].mxu1 %vm262_vm1, %v8672_v16  ;;  %7393 = vmatprep.mubr.msk.f32.mxu0 %vm262_vm1, %v8678_v18  ;;  %v9312_v16 = vld [vmem:[%s8609_s27 + $0x180] sm:$0xff] }
  0x9c   : > { %7443 = vmatprep.mubr.msk.f32.mxu1 %vm262_vm1, %v8678_v18  ;;  %v10617_v18 = vld [vmem:[#allocation5_spill] sm:$0xff] }
  0x9e   : > { %7394 = vmatmul.mubr.msk.f32.gmra.mrb[4].mxu0 %vm262_vm1, %v8692_v20 }
  0x9f   : > { %7444 = vmatmul.mubr.msk.f32.gmra.mrb[36].mxu1 %vm262_vm1, %v8692_v20  ;;  %7396 = vmatprep.mubr.msk.f32.mxu0 %vm262_vm1, %v8698_v22  ;;  %v9323_v20 = vld [vmem:[%s8609_s27 + $0x188] sm:$0xff] }
  0xa0   : > { %7446 = vmatprep.mubr.msk.f32.mxu1 %vm262_vm1, %v8698_v22  ;;  %v9340_v22 = vld [vmem:[%s10521_s1 + $0x28] sm:$0xf] }
  0xa2   : > { %7397 = vmatmul.mubr.msk.f32.gmra.mrb[6].mxu0 %vm262_vm1, %v8712_v24 }
  0xa3   : > { %7447 = vmatmul.mubr.msk.f32.gmra.mrb[38].mxu1 %vm262_vm1, %v8712_v24  ;;  %7399 = vmatprep.mubr.msk.f32.mxu0 %vm262_vm1, %v8718_v26  ;;  %v9345_v24 = vld [vmem:[%s10521_s1 + $0x2c] sm:$0xf] }
  0xa4   : > { %7449 = vmatprep.mubr.msk.f32.mxu1 %vm262_vm1, %v8718_v26  ;;  %v9464_v26 = vld [vmem:[%s8609_s27 + $0x181] sm:$0xff] }
  0xa6   : > { %7400 = vmatmul.mubr.msk.f32.gmra.mrb[8].mxu0 %vm262_vm1, %v8732_v28 }
  0xa7   : > { %7450 = vmatmul.mubr.msk.f32.gmra.mrb[40].mxu1 %vm262_vm1, %v8732_v28  ;;  %7402 = vmatprep.mubr.msk.f32.mxu0 %vm262_vm1, %v8738_v30  ;;  %v9475_v28 = vld [vmem:[%s8609_s27 + $0x189] sm:$0xff] }
  0xa8   : > { %7452 = vmatprep.mubr.msk.f32.mxu1 %vm262_vm1, %v8738_v30  ;;  %v9492_v30 = vld [vmem:[%s10521_s1 + $0x30] sm:$0xf] }
  0xaa   : > { %7403 = vmatmul.mubr.msk.f32.gmra.mrb[10].mxu0 %vm262_vm1, %v8752_v32 }
  0xab   : > { %7453 = vmatmul.mubr.msk.f32.gmra.mrb[42].mxu1 %vm262_vm1, %v8752_v32  ;;  %7405 = vmatprep.mubr.msk.f32.mxu0 %vm262_vm1, %v8758_v34  ;;  %v9497_v32 = vld [vmem:[%s10521_s1 + $0x38] sm:$0xf] }
  0xac   : > { %7455 = vmatprep.mubr.msk.f32.mxu1 %vm262_vm1, %v8758_v34  ;;  %v10628_v34 = vld [vmem:[#allocation16_spill] sm:$0xff] }
  0xae   : > { %7406 = vmatmul.mubr.msk.f32.gmra.mrb[12].mxu0 %vm262_vm1, %v8772_v36 }
  0xaf   : > { %7456 = vmatmul.mubr.msk.f32.gmra.mrb[44].mxu1 %vm262_vm1, %v8772_v36  ;;  %7408 = vmatprep.mubr.msk.f32.mxu0 %vm262_vm1, %v8778_v38  ;;  %v10630_v36 = vld [vmem:[#allocation18_spill] sm:$0xff] }
  0xb0   : > { %7458 = vmatprep.mubr.msk.f32.mxu1 %vm262_vm1, %v8778_v38  ;;  %v10632_v38 = vld [vmem:[#allocation20_spill] sm:$0xff] }
  0xb2   : > { %7409 = vmatmul.mubr.msk.f32.gmra.mrb[14].mxu0 %vm262_vm1, %v8792_v40 }
  0xb3   : > { %7459 = vmatmul.mubr.msk.f32.gmra.mrb[46].mxu1 %vm262_vm1, %v8792_v40  ;;  %7411 = vmatprep.mubr.msk.f32.mxu0 %vm262_vm1, %v8798_v42  ;;  %v10634_v40 = vld [vmem:[#allocation22_spill] sm:$0xff] }
  0xb4   : > { %7461 = vmatprep.mubr.msk.f32.mxu1 %vm262_vm1, %v8798_v42  ;;  %v10636_v42 = vld [vmem:[#allocation24_spill] sm:$0xff] }
  0xb6   : > { %7412 = vmatmul.mubr.msk.f32.gmra.mrb[16].mxu0 %vm262_vm1, %v8812_v44 }
  0xb7   : > { %7462 = vmatmul.mubr.msk.f32.gmra.mrb[48].mxu1 %vm262_vm1, %v8812_v44  ;;  %7414 = vmatprep.mubr.msk.f32.mxu0 %vm262_vm1, %v8818_v46  ;;  %v10638_v44 = vld [vmem:[#allocation26_spill] sm:$0xff] }
  0xb8   : > { %7464 = vmatprep.mubr.msk.f32.mxu1 %vm262_vm1, %v8818_v46  ;;  %v10640_v46 = vld [vmem:[#allocation28_spill] sm:$0xff] }
  0xba   : > { %7415 = vmatmul.mubr.msk.f32.gmra.mrb[18].mxu0 %vm262_vm1, %v8832_v48 }
  0xbb   : > { %7465 = vmatmul.mubr.msk.f32.gmra.mrb[50].mxu1 %vm262_vm1, %v8832_v48  ;;  %7417 = vmatprep.mubr.msk.f32.mxu0 %vm262_vm1, %v8838_v50  ;;  %v10642_v48 = vld [vmem:[#allocation30_spill] sm:$0xff] }
  0xbc   : > { %7467 = vmatprep.mubr.msk.f32.mxu1 %vm262_vm1, %v8838_v50  ;;  %v10643_v50 = vld [vmem:[#allocation31_spill] sm:$0xff] }
  0xbe   : > { %7418 = vmatmul.mubr.msk.f32.gmra.mrb[20].mxu0 %vm262_vm1, %v8852_v52 }
  0xbf   : > { %7468 = vmatmul.mubr.msk.f32.gmra.mrb[52].mxu1 %vm262_vm1, %v8852_v52  ;;  %7420 = vmatprep.mubr.msk.f32.mxu0 %vm262_vm1, %v8858_v54  ;;  %v6326_v52 = vld [vmem:[%s8609_s27 + $0x30] sm:$0xff] }
  0xc0   : > { %7470 = vmatprep.mubr.msk.f32.mxu1 %vm262_vm1, %v8858_v54  ;;  %v6327_v54 = vld [vmem:[%s8609_s27 + $0x38] sm:$0xff] }
  0xc2   : > { %7421 = vmatmul.mubr.msk.f32.gmra.mrb[22].mxu0 %vm262_vm1, %v8872_v56 }
  0xc3   : > { %7471 = vmatmul.mubr.msk.f32.gmra.mrb[54].mxu1 %vm262_vm1, %v8872_v56  ;;  %7423 = vmatprep.mubr.msk.f32.mxu0 %vm262_vm1, %v8878_v58  ;;  %v6328_v56 = vld [vmem:[%s8609_s27 + $0x48] sm:$0xff] }
  0xc4   : > { %7473 = vmatprep.mubr.msk.f32.mxu1 %vm262_vm1, %v8878_v58  ;;  %v6329_v58 = vld [vmem:[%s8609_s27 + $0x50] sm:$0xff] }
  0xc6   : > { %7424 = vmatmul.mubr.msk.f32.gmra.mrb[24].mxu0 %vm262_vm1, %v8892_v60 }
  0xc7   : > { %7474 = vmatmul.mubr.msk.f32.gmra.mrb[56].mxu1 %vm262_vm1, %v8892_v60  ;;  %7426 = vmatprep.mubr.msk.f32.mxu0 %vm262_vm1, %v10614_v8  ;;  %v6330_v60 = vld [vmem:[%s8609_s27 + $0x60] sm:$0xff] }
  0xc8   : > { %7476 = vmatprep.mubr.msk.f32.mxu1 %vm262_vm1, %v10614_v8  ;;  %v9861_v8 = vld [vmem:[%s10522_s2] ss:$0 sm:$0xff] }
  0xca   : > { %7427 = vmatmul.mubr.msk.f32.gmra.mrb[26].mxu0 %vm262_vm1, %v10615_v12 }
  0xcb   : > { %7477 = vmatmul.mubr.msk.f32.gmra.mrb[58].mxu1 %vm262_vm1, %v10615_v12  ;;  %7429 = vmatprep.mubr.msk.f32.mxu0 %vm262_vm1, %v10616_v14  ;;  %v6337_v12 = vld [vmem:[%s8609_s27 + $0xb0] sm:$0xff] }
  0xcc   : > { %7479 = vmatprep.mubr.msk.f32.mxu1 %vm262_vm1, %v10616_v14  ;;  %v9868_v14 = vld [vmem:[%s8609_s27 + $0xb1] sm:$0xff] }
  0xce   : > { %7430 = vmatmul.mubr.msk.f32.gmra.mrb[28].mxu0 %vm262_vm1, %v10617_v18 }
  0xcf   : > { %7480 = vmatmul.mubr.msk.f32.gmra.mrb[60].mxu1 %vm262_vm1, %v10617_v18  ;;  %7432 = vmatprep.mubr.msk.f32.mxu0 %vm262_vm1, %v9312_v16  ;;  %v6338_v18 = vld [vmem:[%s8609_s27 + $0xc0] sm:$0xff] }
  0xd0   : > { %7482 = vmatprep.mubr.msk.f32.mxu1 %vm262_vm1, %v9312_v16 }
  0xd2   : > { %7433 = vmatmul.mubr.msk.f32.gmra.mrb[30].mxu0 %vm262_vm1, %v9323_v20 }
  0xd3   : > { %7483 = vmatmul.mubr.msk.f32.gmra.mrb[62].mxu1 %vm262_vm1, %v9323_v20  ;;  %7487 = vmatprep.mubr.msk.f32.mxu0 %vm262_vm1, %v8626_v9 }
  0xd4   : > { %7537 = vmatprep.mubr.msk.f32.mxu1 %vm262_vm1, %v8626_v9 }
  0xd6   : > { %7488 = vmatmul.mubr.msk.f32.vlgmr.msra.gmra.mrb[0].mxu0 %vm262_vm1, %v8647_v13 }
  0xd7   : > { %7538 = vmatmul.mubr.msk.f32.vlgmr.msra.gmra.mrb[0].mxu1 %vm262_vm1, %v8647_v13  ;;  %7636 = vmatpush3.msk.msra.mxu0 %vm359_vm0, %v9193_v2  ;;  %v9852_v2 = vld [vmem:[%s8609_s27 + $0xa9] sm:$0xff] }
  0xd8   : > { %7586 = vmatpush3.msk.msra.mxu1 %vm359_vm0, %v9188_v7  ;;  %7490 = vmatprep.mubr.msk.f32.mxu0 %vm262_vm1, %v8657_v15  ;;  %v9838_v7 = vld [vmem:[%s8609_s27 + $0x91] sm:$0xff] }
  0xd9   : > { %7540 = vmatprep.mubr.msk.f32.mxu1 %vm262_vm1, %v8657_v15  ;;  %7685 = vmatprep.subr.msk.mxu1 %vm359_vm0, %v9340_v22 }
  0xda   : > { %7735 = vmatprep.subr.msk.mxu0 %vm359_vm0, %v9345_v24  ;;  %7491 = vmatmul.mubr.msk.f32.gmra.mrb[2].mxu0 %vm262_vm1, %v8675_v17 }
  0xdb   : > { %7541 = vmatmul.mubr.msk.f32.gmra.mrb[2].mxu1 %vm262_vm1, %v8675_v17  ;;  %7493 = vmatprep.mubr.msk.f32.mxu0 %vm262_vm1, %v8681_v19 }
  0xdc   : > { %7543 = vmatprep.mubr.msk.f32.mxu1 %vm262_vm1, %v8681_v19 }
  0xde   : > { %7494 = vmatmul.mubr.msk.f32.gmra.mrb[4].mxu0 %vm262_vm1, %v8695_v21 }
  0xdf   : > { %7544 = vmatmul.mubr.msk.f32.gmra.mrb[4].mxu1 %vm262_vm1, %v8695_v21  ;;  %7496 = vmatprep.mubr.msk.f32.mxu0 %vm262_vm1, %v8701_v23 }
  0xe0   : > { %7546 = vmatprep.mubr.msk.f32.mxu1 %vm262_vm1, %v8701_v23 }
  0xe2   : > { %7497 = vmatmul.mubr.msk.f32.gmra.mrb[6].mxu0 %vm262_vm1, %v8715_v25 }
  0xe3   : > { %7547 = vmatmul.mubr.msk.f32.gmra.mrb[6].mxu1 %vm262_vm1, %v8715_v25  ;;  %7499 = vmatprep.mubr.msk.f32.mxu0 %vm262_vm1, %v8721_v27 }
  0xe4   : > { %7549 = vmatprep.mubr.msk.f32.mxu1 %vm262_vm1, %v8721_v27 }
  0xe6   : > { %7500 = vmatmul.mubr.msk.f32.gmra.mrb[8].mxu0 %vm262_vm1, %v8735_v29 }
  0xe7   : > { %7550 = vmatmul.mubr.msk.f32.gmra.mrb[8].mxu1 %vm262_vm1, %v8735_v29  ;;  %7502 = vmatprep.mubr.msk.f32.mxu0 %vm262_vm1, %v8741_v31 }
  0xe8   : > { %7552 = vmatprep.mubr.msk.f32.mxu1 %vm262_vm1, %v8741_v31 }
  0xea   : > { %7503 = vmatmul.mubr.msk.f32.gmra.mrb[10].mxu0 %vm262_vm1, %v8755_v33 }
  0xeb   : > { %7553 = vmatmul.mubr.msk.f32.gmra.mrb[10].mxu1 %vm262_vm1, %v8755_v33  ;;  %7505 = vmatprep.mubr.msk.f32.mxu0 %vm262_vm1, %v8761_v35 }
  0xec   : > { %7555 = vmatprep.mubr.msk.f32.mxu1 %vm262_vm1, %v8761_v35 }
  0xee   : > { %7506 = vmatmul.mubr.msk.f32.gmra.mrb[12].mxu0 %vm262_vm1, %v8775_v37 }
  0xef   : > { %7556 = vmatmul.mubr.msk.f32.gmra.mrb[12].mxu1 %vm262_vm1, %v8775_v37  ;;  %7508 = vmatprep.mubr.msk.f32.mxu0 %vm262_vm1, %v8781_v39 }
  0xf0   : > { %7558 = vmatprep.mubr.msk.f32.mxu1 %vm262_vm1, %v8781_v39 }
  0xf2   : > { %7509 = vmatmul.mubr.msk.f32.gmra.mrb[14].mxu0 %vm262_vm1, %v8795_v41 }
  0xf3   : > { %7559 = vmatmul.mubr.msk.f32.gmra.mrb[14].mxu1 %vm262_vm1, %v8795_v41  ;;  %7511 = vmatprep.mubr.msk.f32.mxu0 %vm262_vm1, %v8801_v43 }
  0xf4   : > { %7561 = vmatprep.mubr.msk.f32.mxu1 %vm262_vm1, %v8801_v43 }
  0xf6   : > { %7512 = vmatmul.mubr.msk.f32.gmra.mrb[16].mxu0 %vm262_vm1, %v8815_v45 }
  0xf7   : > { %7562 = vmatmul.mubr.msk.f32.gmra.mrb[16].mxu1 %vm262_vm1, %v8815_v45  ;;  %7514 = vmatprep.mubr.msk.f32.mxu0 %vm262_vm1, %v8821_v47 }
  0xf8   : > { %7564 = vmatprep.mubr.msk.f32.mxu1 %vm262_vm1, %v8821_v47 }
  0xfa   : > { %7515 = vmatmul.mubr.msk.f32.gmra.mrb[18].mxu0 %vm262_vm1, %v8835_v49 }
  0xfb   : > { %7565 = vmatmul.mubr.msk.f32.gmra.mrb[18].mxu1 %vm262_vm1, %v8835_v49  ;;  %7517 = vmatprep.mubr.msk.f32.mxu0 %vm262_vm1, %v8841_v51 }
  0xfc   : > { %7567 = vmatprep.mubr.msk.f32.mxu1 %vm262_vm1, %v8841_v51 }
  0xfe   : > { %7518 = vmatmul.mubr.msk.f32.gmra.mrb[20].mxu0 %vm262_vm1, %v8855_v53 }
  0xff   : > { %7568 = vmatmul.mubr.msk.f32.gmra.mrb[20].mxu1 %vm262_vm1, %v8855_v53  ;;  %7520 = vmatprep.mubr.msk.f32.mxu0 %vm262_vm1, %v8861_v55 }
 0x100   : > { %7570 = vmatprep.mubr.msk.f32.mxu1 %vm262_vm1, %v8861_v55 }
 0x102   : > { %7521 = vmatmul.mubr.msk.f32.gmra.mrb[22].mxu0 %vm262_vm1, %v8875_v57 }
 0x103   : > { %7571 = vmatmul.mubr.msk.f32.gmra.mrb[22].mxu1 %vm262_vm1, %v8875_v57  ;;  %7523 = vmatprep.mubr.msk.f32.mxu0 %vm262_vm1, %v8881_v59 }
 0x104   : > { %7573 = vmatprep.mubr.msk.f32.mxu1 %vm262_vm1, %v8881_v59 }
 0x106   : > { %7524 = vmatmul.mubr.msk.f32.gmra.mrb[24].mxu0 %vm262_vm1, %v8895_v61 }
 0x107   : > { %7574 = vmatmul.mubr.msk.f32.gmra.mrb[24].mxu1 %vm262_vm1, %v8895_v61  ;;  %7526 = vmatprep.mubr.msk.f32.mxu0 %vm262_vm1, %v8901_v63 }
 0x108   : > { %7576 = vmatprep.mubr.msk.f32.mxu1 %vm262_vm1, %v8901_v63 }
 0x10a   : > { %7527 = vmatmul.mubr.msk.f32.gmra.mrb[26].mxu0 %vm262_vm1, %v8915_v1 }
 0x10b   : > { %7577 = vmatmul.mubr.msk.f32.gmra.mrb[26].mxu1 %vm262_vm1, %v8915_v1  ;;  %7529 = vmatprep.mubr.msk.f32.mxu0 %vm262_vm1, %v8921_v3 }
 0x10c   : > { %7579 = vmatprep.mubr.msk.f32.mxu1 %vm262_vm1, %v8921_v3 }
 0x10e   : > { %7530 = vmatmul.mubr.msk.f32.gmra.mrb[28].mxu0 %vm262_vm1, %v8935_v6 }
 0x10f   : > { %7580 = vmatmul.mubr.msk.f32.gmra.mrb[28].mxu1 %vm262_vm1, %v8935_v6  ;;  %7532 = vmatprep.mubr.msk.f32.mxu0 %vm262_vm1, %v9464_v26 }
 0x110   : > { %7582 = vmatprep.mubr.msk.f32.mxu1 %vm262_vm1, %v9464_v26 }
 0x112   : > { %7533 = vmatmul.mubr.msk.f32.gmra.mrb[30].mxu0 %vm262_vm1, %v9475_v28 }
 0x113   : > { %7583 = vmatmul.mubr.msk.f32.gmra.mrb[30].mxu1 %vm262_vm1, %v9475_v28  ;;  %7637 = vmatprep.mubr.msk.f32.mxu0 %vm262_vm1, %v8626_v9 }
 0x114   : > { %7587 = vmatprep.mubr.msk.f32.mxu1 %vm262_vm1, %v8626_v9  ;;  %v10618_v9 = vld [vmem:[#allocation6_spill] sm:$0xff] }
 0x116   : > { %7638 = vmatmul.mubr.msk.f32.vlgmr.msra.gmra.mrb[32].mxu0 %vm262_vm1, %v8647_v13 }
 0x117   : > { %7588 = vmatmul.mubr.msk.f32.vlgmr.msra.gmra.mrb[32].mxu1 %vm262_vm1, %v8647_v13  ;;  %7736 = vmatpush3.msk.msra.mxu0 %vm359_vm0, %v9345_v24  ;;  %v9638_v13 = vld [vmem:[%s10521_s1 + $0x34] sm:$0xf] }
 0x118   : > { %7686 = vmatpush3.msk.msra.mxu1 %vm359_vm0, %v9340_v22  ;;  %7590 = vmatprep.mubr.msk.f32.mxu1 %vm262_vm1, %v8657_v15  ;;  %v9872_v22 = vld [vmem:[%s8609_s27 + $0xc1] sm:$0xff] }
 0x119   : > { %7640 = vmatprep.mubr.msk.f32.mxu0 %vm262_vm1, %v8657_v15  ;;  %7785 = vmatprep.subr.msk.mxu1 %vm359_vm0, %v9492_v30  ;;  %v9643_v15 = vld [vmem:[%s10521_s1 + $0x3c] sm:$0xf] }
 0x11a   : > { %7885 = vmatprep.subr.msk.mxu0 %vm359_vm0, %v9497_v32  ;;  %7641 = vmatmul.mubr.msk.f32.gmra.mrb[34].mxu0 %vm262_vm1, %v8675_v17 }
 0x11b   : > { %7591 = vmatmul.mubr.msk.f32.gmra.mrb[34].mxu1 %vm262_vm1, %v8675_v17  ;;  %7643 = vmatprep.mubr.msk.f32.mxu0 %vm262_vm1, %v8681_v19  ;;  %v10619_v17 = vld [vmem:[#allocation7_spill] sm:$0xff] }
 0x11c   : > { %7593 = vmatprep.mubr.msk.f32.mxu1 %vm262_vm1, %v8681_v19  ;;  %v10620_v19 = vld [vmem:[#allocation8_spill] sm:$0xff] }
 0x11e   : > { %7644 = vmatmul.mubr.msk.f32.gmra.mrb[36].mxu0 %vm262_vm1, %v8695_v21 }
 0x11f   : > { %7594 = vmatmul.mubr.msk.f32.gmra.mrb[36].mxu1 %vm262_vm1, %v8695_v21  ;;  %7646 = vmatprep.mubr.msk.f32.mxu0 %vm262_vm1, %v8701_v23  ;;  %v10621_v21 = vld [vmem:[#allocation9_spill] sm:$0xff] }
 0x120   : > { %7596 = vmatprep.mubr.msk.f32.mxu1 %vm262_vm1, %v8701_v23  ;;  %v10622_v23 = vld [vmem:[#allocation10_spill] sm:$0xff] }
 0x122   : > { %7647 = vmatmul.mubr.msk.f32.gmra.mrb[38].mxu0 %vm262_vm1, %v8715_v25 }
 0x123   : > { %7597 = vmatmul.mubr.msk.f32.gmra.mrb[38].mxu1 %vm262_vm1, %v8715_v25  ;;  %7649 = vmatprep.mubr.msk.f32.mxu0 %vm262_vm1, %v8721_v27  ;;  %v10623_v25 = vld [vmem:[#allocation11_spill] sm:$0xff] }
 0x124   : > { %7599 = vmatprep.mubr.msk.f32.mxu1 %vm262_vm1, %v8721_v27  ;;  %v10624_v27 = vld [vmem:[#allocation12_spill] sm:$0xff] }
 0x126   : > { %7650 = vmatmul.mubr.msk.f32.gmra.mrb[40].mxu0 %vm262_vm1, %v8735_v29 }
 0x127   : > { %7600 = vmatmul.mubr.msk.f32.gmra.mrb[40].mxu1 %vm262_vm1, %v8735_v29  ;;  %7652 = vmatprep.mubr.msk.f32.mxu0 %vm262_vm1, %v8741_v31  ;;  %v10625_v29 = vld [vmem:[#allocation13_spill] sm:$0xff] }
 0x128   : > { %7602 = vmatprep.mubr.msk.f32.mxu1 %vm262_vm1, %v8741_v31  ;;  %v10626_v31 = vld [vmem:[#allocation14_spill] sm:$0xff] }
 0x12a   : > { %7653 = vmatmul.mubr.msk.f32.gmra.mrb[42].mxu0 %vm262_vm1, %v8755_v33 }
 0x12b   : > { %7603 = vmatmul.mubr.msk.f32.gmra.mrb[42].mxu1 %vm262_vm1, %v8755_v33  ;;  %7655 = vmatprep.mubr.msk.f32.mxu0 %vm262_vm1, %v8761_v35  ;;  %v10627_v33 = vld [vmem:[#allocation15_spill] sm:$0xff] }
 0x12c   : > { %7605 = vmatprep.mubr.msk.f32.mxu1 %vm262_vm1, %v8761_v35  ;;  %v10629_v35 = vld [vmem:[#allocation17_spill] sm:$0xff] }
 0x12e   : > { %7656 = vmatmul.mubr.msk.f32.gmra.mrb[44].mxu0 %vm262_vm1, %v8775_v37 }
 0x12f   : > { %7606 = vmatmul.mubr.msk.f32.gmra.mrb[44].mxu1 %vm262_vm1, %v8775_v37  ;;  %7658 = vmatprep.mubr.msk.f32.mxu0 %vm262_vm1, %v8781_v39  ;;  %v10631_v37 = vld [vmem:[#allocation19_spill] sm:$0xff] }
 0x130   : > { %7608 = vmatprep.mubr.msk.f32.mxu1 %vm262_vm1, %v8781_v39  ;;  %v10633_v39 = vld [vmem:[#allocation21_spill] sm:$0xff] }
 0x132   : > { %7659 = vmatmul.mubr.msk.f32.gmra.mrb[46].mxu0 %vm262_vm1, %v8795_v41 }
 0x133   : > { %7609 = vmatmul.mubr.msk.f32.gmra.mrb[46].mxu1 %vm262_vm1, %v8795_v41  ;;  %7661 = vmatprep.mubr.msk.f32.mxu0 %vm262_vm1, %v8801_v43  ;;  %v10635_v41 = vld [vmem:[#allocation23_spill] sm:$0xff] }
 0x134   : > { %7611 = vmatprep.mubr.msk.f32.mxu1 %vm262_vm1, %v8801_v43  ;;  %v10637_v43 = vld [vmem:[#allocation25_spill] sm:$0xff] }
 0x136   : > { %7662 = vmatmul.mubr.msk.f32.gmra.mrb[48].mxu0 %vm262_vm1, %v8815_v45 }
 0x137   : > { %7612 = vmatmul.mubr.msk.f32.gmra.mrb[48].mxu1 %vm262_vm1, %v8815_v45  ;;  %7664 = vmatprep.mubr.msk.f32.mxu0 %vm262_vm1, %v8821_v47  ;;  %v10639_v45 = vld [vmem:[#allocation27_spill] sm:$0xff] }
 0x138   : > { %7614 = vmatprep.mubr.msk.f32.mxu1 %vm262_vm1, %v8821_v47  ;;  %v10641_v47 = vld [vmem:[#allocation29_spill] sm:$0xff] }
 0x13a   : > { %7665 = vmatmul.mubr.msk.f32.gmra.mrb[50].mxu0 %vm262_vm1, %v8835_v49 }
 0x13b   : > { %7615 = vmatmul.mubr.msk.f32.gmra.mrb[50].mxu1 %vm262_vm1, %v8835_v49  ;;  %7667 = vmatprep.mubr.msk.f32.mxu0 %vm262_vm1, %v8841_v51  ;;  %v9762_v49 = vld [vmem:[%s8609_s27 + $0x182] sm:$0xff] }
 0x13c   : > { %7617 = vmatprep.mubr.msk.f32.mxu1 %vm262_vm1, %v8841_v51  ;;  %v9773_v51 = vld [vmem:[%s8609_s27 + $0x18a] sm:$0xff] }
 0x13e   : > { %7668 = vmatmul.mubr.msk.f32.gmra.mrb[52].mxu0 %vm262_vm1, %v8855_v53 }
 0x13f   : > { %7618 = vmatmul.mubr.msk.f32.gmra.mrb[52].mxu1 %vm262_vm1, %v8855_v53  ;;  %7670 = vmatprep.mubr.msk.f32.mxu0 %vm262_vm1, %v8861_v55  ;;  %v9777_v53 = vld [vmem:[%s8609_s27 + $0x31] sm:$0xff] }
 0x140   : > { %7620 = vmatprep.mubr.msk.f32.mxu1 %vm262_vm1, %v8861_v55  ;;  %v9788_v55 = vld [vmem:[%s8609_s27 + $0x39] sm:$0xff] }
 0x142   : > { %7671 = vmatmul.mubr.msk.f32.gmra.mrb[54].mxu0 %vm262_vm1, %v8875_v57 }
 0x143   : > { %7621 = vmatmul.mubr.msk.f32.gmra.mrb[54].mxu1 %vm262_vm1, %v8875_v57  ;;  %7673 = vmatprep.mubr.msk.f32.mxu0 %vm262_vm1, %v8881_v59  ;;  %v9792_v57 = vld [vmem:[%s8609_s27 + $0x49] sm:$0xff] }
 0x144   : > { %7623 = vmatprep.mubr.msk.f32.mxu1 %vm262_vm1, %v8881_v59  ;;  %v9803_v59 = vld [vmem:[%s8609_s27 + $0x51] sm:$0xff] }
 0x146   : > { %7674 = vmatmul.mubr.msk.f32.gmra.mrb[56].mxu0 %vm262_vm1, %v8895_v61 }
 0x147   : > { %7624 = vmatmul.mubr.msk.f32.gmra.mrb[56].mxu1 %vm262_vm1, %v8895_v61  ;;  %7676 = vmatprep.mubr.msk.f32.mxu0 %vm262_vm1, %v8901_v63  ;;  %v9810_v61 = vld [vmem:[%s8609_s27 + $0x61] sm:$0xff] }
 0x148   : > { %7626 = vmatprep.mubr.msk.f32.mxu1 %vm262_vm1, %v8901_v63  ;;  %v6331_v63 = vld [vmem:[%s8609_s27 + $0x68] sm:$0xff] }
 0x14a   : > { %7677 = vmatmul.mubr.msk.f32.gmra.mrb[58].mxu0 %vm262_vm1, %v8915_v1 }
 0x14b   : > { %7627 = vmatmul.mubr.msk.f32.gmra.mrb[58].mxu1 %vm262_vm1, %v8915_v1  ;;  %7679 = vmatprep.mubr.msk.f32.mxu0 %vm262_vm1, %v8921_v3  ;;  %v6332_v1 = vld [vmem:[%s8609_s27 + $0x78] sm:$0xff] }
 0x14c   : > { %7629 = vmatprep.mubr.msk.f32.mxu1 %vm262_vm1, %v8921_v3  ;;  %v9824_v3 = vld [vmem:[%s8609_s27 + $0x79] sm:$0xff] }
 0x14e   : > { %7680 = vmatmul.mubr.msk.f32.gmra.mrb[60].mxu0 %vm262_vm1, %v8935_v6 }
 0x14f   : > { %7630 = vmatmul.mubr.msk.f32.gmra.mrb[60].mxu1 %vm262_vm1, %v8935_v6  ;;  %7682 = vmatprep.mubr.msk.f32.mxu0 %vm262_vm1, %v9464_v26  ;;  %v9834_v6 = vld [vmem:[%s8609_s27 + $0x81] sm:$0xff] }
 0x150   : > { %7632 = vmatprep.mubr.msk.f32.mxu1 %vm262_vm1, %v9464_v26 }
 0x152   : > { %7683 = vmatmul.mubr.msk.f32.gmra.mrb[62].mxu0 %vm262_vm1, %v9475_v28 }
 0x153   : > { %7633 = vmatmul.mubr.msk.f32.gmra.mrb[62].mxu1 %vm262_vm1, %v9475_v28  ;;  %7737 = vmatprep.mubr.msk.f32.mxu0 %vm262_vm1, %v8947_v0 }
 0x154   : > { %7687 = vmatprep.mubr.msk.f32.mxu1 %vm262_vm1, %v8947_v0  ;;  %v9820_v0 = vld [vmem:[%s8609_s27 + $0x69] sm:$0xff] }
 0x156   : > { %7738 = vmatmul.mubr.msk.f32.vlgmr.msra.gmra.mrb[32].mxu0 %vm262_vm1, %v10618_v9 }
 0x157   : > { %7688 = vmatmul.mubr.msk.f32.vlgmr.msra.gmra.mrb[0].mxu1 %vm262_vm1, %v10618_v9  ;;  %7886 = vmatpush3.msk.msra.mxu0 %vm359_vm0, %v9497_v32 }
 0x158   : > { %7786 = vmatpush3.msk.msra.mxu1 %vm359_vm0, %v9492_v30  ;;  %7690 = vmatprep.mubr.msk.f32.mxu1 %vm262_vm1, %v10619_v17 }
 0x159   : > { %7740 = vmatprep.mubr.msk.f32.mxu0 %vm262_vm1, %v10619_v17  ;;  %7835 = vmatprep.subr.msk.mxu1 %vm359_vm0, %v9638_v13  ;;  %v6340_v17 = vld [vmem:[%s8609_s27 + $0xd8] sm:$0xff] }
 0x15a   : > { %7935 = vmatprep.subr.msk.mxu0 %vm359_vm0, %v9643_v15  ;;  %7741 = vmatmul.mubr.msk.f32.gmra.mrb[34].mxu0 %vm262_vm1, %v10620_v19 }
 0x15b   : > { %7691 = vmatmul.mubr.msk.f32.gmra.mrb[2].mxu1 %vm262_vm1, %v10620_v19  ;;  %7743 = vmatprep.mubr.msk.f32.mxu0 %vm262_vm1, %v10621_v21  ;;  %v9895_v19 = vld [vmem:[%s8609_s27 + $0xd9] sm:$0xff] }
 0x15c   : > { %7693 = vmatprep.mubr.msk.f32.mxu1 %vm262_vm1, %v10621_v21 }
 0x15e   : > { %7744 = vmatmul.mubr.msk.f32.gmra.mrb[36].mxu0 %vm262_vm1, %v10622_v23 }
 0x15f   : > { %7694 = vmatmul.mubr.msk.f32.gmra.mrb[4].mxu1 %vm262_vm1, %v10622_v23  ;;  %7746 = vmatprep.mubr.msk.f32.mxu0 %vm262_vm1, %v10623_v25 }
 0x160   : > { %7696 = vmatprep.mubr.msk.f32.mxu1 %vm262_vm1, %v10623_v25 }
 0x162   : > { %7747 = vmatmul.mubr.msk.f32.gmra.mrb[38].mxu0 %vm262_vm1, %v10624_v27 }
 0x163   : > { %7697 = vmatmul.mubr.msk.f32.gmra.mrb[6].mxu1 %vm262_vm1, %v10624_v27  ;;  %7749 = vmatprep.mubr.msk.f32.mxu0 %vm262_vm1, %v10625_v29 }
 0x164   : > { %7699 = vmatprep.mubr.msk.f32.mxu1 %vm262_vm1, %v10625_v29  ;;  %v6341_v29 = vld [vmem:[%s8609_s27 + $0xe0] sm:$0xff] }
 0x166   : > { %7750 = vmatmul.mubr.msk.f32.gmra.mrb[40].mxu0 %vm262_vm1, %v10626_v31 }
 0x167   : > { %7700 = vmatmul.mubr.msk.f32.gmra.mrb[8].mxu1 %vm262_vm1, %v10626_v31  ;;  %7752 = vmatprep.mubr.msk.f32.mxu0 %vm262_vm1, %v10627_v33  ;;  %v9909_v31 = vld [vmem:[%s8609_s27 + $0xe1] sm:$0xff] }
 0x168   : > { %7702 = vmatprep.mubr.msk.f32.mxu1 %vm262_vm1, %v10627_v33  ;;  %v6342_v33 = vld [vmem:[%s8609_s27 + $0xf0] sm:$0xff] }
 0x16a   : > { %7753 = vmatmul.mubr.msk.f32.gmra.mrb[42].mxu0 %vm262_vm1, %v10628_v34 }
 0x16b   : > { %7703 = vmatmul.mubr.msk.f32.gmra.mrb[10].mxu1 %vm262_vm1, %v10628_v34  ;;  %7755 = vmatprep.mubr.msk.f32.mxu0 %vm262_vm1, %v10629_v35  ;;  %v9915_v34 = vld [vmem:[%s8609_s27 + $0xf1] sm:$0xff] }
 0x16c   : > { %7705 = vmatprep.mubr.msk.f32.mxu1 %vm262_vm1, %v10629_v35 }
 0x16e   : > { %7756 = vmatmul.mubr.msk.f32.gmra.mrb[44].mxu0 %vm262_vm1, %v10630_v36 }
 0x16f   : > { %7706 = vmatmul.mubr.msk.f32.gmra.mrb[12].mxu1 %vm262_vm1, %v10630_v36  ;;  %7758 = vmatprep.mubr.msk.f32.mxu0 %vm262_vm1, %v10631_v37 }
 0x170   : > { %7708 = vmatprep.mubr.msk.f32.mxu1 %vm262_vm1, %v10631_v37 }
 0x172   : > { %7759 = vmatmul.mubr.msk.f32.gmra.mrb[46].mxu0 %vm262_vm1, %v10632_v38 }
 0x173   : > { %7709 = vmatmul.mubr.msk.f32.gmra.mrb[14].mxu1 %vm262_vm1, %v10632_v38  ;;  %7761 = vmatprep.mubr.msk.f32.mxu0 %vm262_vm1, %v10633_v39 }
 0x174   : > { %7711 = vmatprep.mubr.msk.f32.mxu1 %vm262_vm1, %v10633_v39  ;;  %v6343_v39 = vld [vmem:[%s8609_s27 + $0xf8] sm:$0xff] }
 0x176   : > { %7762 = vmatmul.mubr.msk.f32.gmra.mrb[48].mxu0 %vm262_vm1, %v10634_v40 }
 0x177   : > { %7712 = vmatmul.mubr.msk.f32.gmra.mrb[16].mxu1 %vm262_vm1, %v10634_v40  ;;  %7764 = vmatprep.mubr.msk.f32.mxu0 %vm262_vm1, %v10635_v41  ;;  %v9929_v40 = vld [vmem:[%s8609_s27 + $0xf9] sm:$0xff] }
 0x178   : > { %7714 = vmatprep.mubr.msk.f32.mxu1 %vm262_vm1, %v10635_v41  ;;  %v6344_v41 = vld [vmem:[%s8609_s27 + $0x108] sm:$0xff] }
 0x17a   : > { %7765 = vmatmul.mubr.msk.f32.gmra.mrb[50].mxu0 %vm262_vm1, %v10636_v42 }
 0x17b   : > { %7715 = vmatmul.mubr.msk.f32.gmra.mrb[18].mxu1 %vm262_vm1, %v10636_v42  ;;  %7767 = vmatprep.mubr.msk.f32.mxu0 %vm262_vm1, %v10637_v43  ;;  %v9935_v42 = vld [vmem:[%s8609_s27 + $0x109] sm:$0xff] }
 0x17c   : > { %7717 = vmatprep.mubr.msk.f32.mxu1 %vm262_vm1, %v10637_v43 }
 0x17e   : > { %7768 = vmatmul.mubr.msk.f32.gmra.mrb[52].mxu0 %vm262_vm1, %v10638_v44 }
 0x17f   : > { %7718 = vmatmul.mubr.msk.f32.gmra.mrb[20].mxu1 %vm262_vm1, %v10638_v44  ;;  %7770 = vmatprep.mubr.msk.f32.mxu0 %vm262_vm1, %v10639_v45 }
 0x180   : > { %7720 = vmatprep.mubr.msk.f32.mxu1 %vm262_vm1, %v10639_v45 }
 0x182   : > { %7771 = vmatmul.mubr.msk.f32.gmra.mrb[54].mxu0 %vm262_vm1, %v10640_v46 }
 0x183   : > { %7721 = vmatmul.mubr.msk.f32.gmra.mrb[22].mxu1 %vm262_vm1, %v10640_v46  ;;  %7773 = vmatprep.mubr.msk.f32.mxu0 %vm262_vm1, %v9132_v11 }
 0x184   : > { %7723 = vmatprep.mubr.msk.f32.mxu1 %vm262_vm1, %v9132_v11  ;;  %v6336_v11 = vld [vmem:[%s8609_s27 + $0xa8] sm:$0xff] }
 0x186   : > { %7774 = vmatmul.mubr.msk.f32.gmra.mrb[56].mxu0 %vm262_vm1, %v10641_v47 }
 0x187   : > { %7724 = vmatmul.mubr.msk.f32.gmra.mrb[24].mxu1 %vm262_vm1, %v10641_v47  ;;  %7776 = vmatprep.mubr.msk.f32.mxu0 %vm262_vm1, %v9146_v62  ;;  %v6345_v47 = vld [vmem:[%s8609_s27 + $0x110] sm:$0xff] }
 0x188   : > { %7726 = vmatprep.mubr.msk.f32.mxu1 %vm262_vm1, %v9146_v62  ;;  %v6335_v62 = vld [vmem:[%s8609_s27 + $0x98] sm:$0xff] }
 0x18a   : > { %7777 = vmatmul.mubr.msk.f32.gmra.mrb[58].mxu0 %vm262_vm1, %v9157_v10 }
 0x18b   : > { %7727 = vmatmul.mubr.msk.f32.gmra.mrb[26].mxu1 %vm262_vm1, %v9157_v10  ;;  %7779 = vmatprep.mubr.msk.f32.mxu0 %vm262_vm1, %v10642_v48  ;;  %v9848_v10 = vld [vmem:[%s8609_s27 + $0x99] sm:$0xff] }
 0x18c   : > { %7729 = vmatprep.mubr.msk.f32.mxu1 %vm262_vm1, %v10642_v48  ;;  %v9949_v48 = vld [vmem:[%s8609_s27 + $0x111] sm:$0xff] }
 0x18e   : > { %7780 = vmatmul.mubr.msk.f32.gmra.mrb[60].mxu0 %vm262_vm1, %v10643_v50 }
 0x18f   : > { %7730 = vmatmul.mubr.msk.f32.gmra.mrb[28].mxu1 %vm262_vm1, %v10643_v50  ;;  %7782 = vmatprep.mubr.msk.f32.mxu0 %vm262_vm1, %v9762_v49  ;;  %v6346_v50 = vld [vmem:[%s8609_s27 + $0x120] sm:$0xff] }
 0x190   : > { %7732 = vmatprep.mubr.msk.f32.mxu1 %vm262_vm1, %v9762_v49 }
 0x192   : > { %7783 = vmatmul.mubr.msk.f32.gmra.mrb[62].mxu0 %vm262_vm1, %v9773_v51 }
 0x193   : > { %7733 = vmatmul.mubr.msk.f32.gmra.mrb[30].mxu1 %vm262_vm1, %v9773_v51  ;;  %7887 = vmatprep.mubr.msk.f32.mxu0 %vm262_vm1, %v9777_v53 }
 0x194   : > { %7787 = vmatprep.mubr.msk.f32.mxu1 %vm262_vm1, %v6326_v52  ;;  %v9955_v52 = vld [vmem:[%s8609_s27 + $0x121] sm:$0xff] }
 0x196   : > { %7888 = vmatmul.mubr.msk.f32.vlgmr.msra.gmra.mrb[32].mxu0 %vm262_vm1, %v9788_v55 }
 0x197   : > { %7788 = vmatmul.mubr.msk.f32.vlgmr.msra.gmra.mrb[32].mxu1 %vm262_vm1, %v6327_v54  ;;  %7936 = vmatpush3.msk.msra.mxu0 %vm359_vm0, %v9643_v15  ;;  %v9889_v15 = vld [vmem:[%s8609_s27 + $0xc9] sm:$0xff] }
 0x198   : > { %7836 = vmatpush3.msk.msra.mxu1 %vm359_vm0, %v9638_v13  ;;  %7790 = vmatprep.mubr.msk.f32.mxu1 %vm262_vm1, %v6328_v56  ;;  %v6339_v13 = vld [vmem:[%s8609_s27 + $0xc8] sm:$0xff] }
 0x199   : > { %7890 = vmatprep.mubr.msk.f32.mxu0 %vm262_vm1, %v9792_v57 }
 0x19a   : > { %7891 = vmatmul.mubr.msk.f32.gmra.mrb[34].mxu0 %vm262_vm1, %v9803_v59 }
 0x19b   : > { %7791 = vmatmul.mubr.msk.f32.gmra.mrb[34].mxu1 %vm262_vm1, %v6329_v58  ;;  %7893 = vmatprep.mubr.msk.f32.mxu0 %vm262_vm1, %v9810_v61 }
 0x19c   : > { %7793 = vmatprep.mubr.msk.f32.mxu1 %vm262_vm1, %v6330_v60 }
 0x19e   : > { %7894 = vmatmul.mubr.msk.f32.gmra.mrb[36].mxu0 %vm262_vm1, %v9820_v0 }
 0x19f   : > { %7794 = vmatmul.mubr.msk.f32.gmra.mrb[36].mxu1 %vm262_vm1, %v6331_v63  ;;  %7896 = vmatprep.mubr.msk.f32.mxu0 %vm262_vm1, %v9824_v3  ;;  %v6347_v63 = vld [vmem:[%s8609_s27 + $0x128] sm:$0xff] }
 0x1a0   : > { %7796 = vmatprep.mubr.msk.f32.mxu1 %vm262_vm1, %v6332_v1  ;;  %v9969_v1 = vld [vmem:[%s8609_s27 + $0x129] sm:$0xff] }
 0x1a2   : > { %7897 = vmatmul.mubr.msk.f32.gmra.mrb[38].mxu0 %vm262_vm1, %v9834_v6 }
 0x1a3   : > { %7797 = vmatmul.mubr.msk.f32.gmra.mrb[38].mxu1 %vm262_vm1, %v6333_v4  ;;  %7899 = vmatprep.mubr.msk.f32.mxu0 %vm262_vm1, %v9838_v7  ;;  %v6348_v4 = vld [vmem:[%s8609_s27 + $0x138] sm:$0xff] }
 0x1a4   : > { %7799 = vmatprep.mubr.msk.f32.mxu1 %vm262_vm1, %v6334_v5  ;;  %v9975_v5 = vld [vmem:[%s8609_s27 + $0x139] sm:$0xff] }
 0x1a6   : > { %7900 = vmatmul.mubr.msk.f32.gmra.mrb[40].mxu0 %vm262_vm1, %v9848_v10 }
 0x1a7   : > { %7800 = vmatmul.mubr.msk.f32.gmra.mrb[40].mxu1 %vm262_vm1, %v6335_v62  ;;  %7902 = vmatprep.mubr.msk.f32.mxu0 %vm262_vm1, %v9852_v2 }
 0x1a8   : > { %7802 = vmatprep.mubr.msk.f32.mxu1 %vm262_vm1, %v6336_v11 }
 0x1a9   : > { %v7489_v24 = vpop.f32.mrb[0].mxu0 }
 0x1aa   : > { %v7985_v30 = vadd.f32 %v7489_v24, %v9861_v8  ;;  %v2514_v32 = vpop.f32.mrb[1].mxu0  ;;  %7903 = vmatmul.mubr.msk.f32.gmra.mrb[42].mxu0 %vm262_vm1, %v9868_v14  ;;  %v6349_v24 = vld [vmem:[%s8609_s27 + $0x140] sm:$0xff] }
 0x1ab   : > { %7803 = vmatmul.mubr.msk.f32.gmra.mrb[42].mxu1 %vm262_vm1, %v6337_v12  ;;  %v7986_v9 = vadd.f32 %v9861_v8, %v2514_v32  ;;  %7905 = vmatprep.mubr.msk.f32.mxu0 %vm262_vm1, %v9872_v22  ;;  %v6350_v32 = vld [vmem:[%s8609_s27 + $0x150] sm:$0xff] }
 0x1ac   : > { %7805 = vmatprep.mubr.msk.f32.mxu1 %vm262_vm1, %v6338_v18  ;;  %5577 = vst.msk [vmem:[%s9877_s7 + $0x8] sm:$0xff] %vm262_vm1, %v7985_v30  ;;  %v9989_v30 = vld [vmem:[%s8609_s27 + $0x141] sm:$0xff] }
 0x1ad   : > { %5576 = vst.msk [vmem:[%s9877_s7] sm:$0xff] %vm262_vm1, %v7986_v9  ;;  %v7492_v21 = vpop.f32.mrb[2].mxu0  ;;  %v9995_v9 = vld [vmem:[%s8609_s27 + $0x151] sm:$0xff] }
 0x1ae   : > { %v7987_v23 = vadd.f32 %v7492_v21, %v9861_v8  ;;  %v2524_v25 = vpop.f32.mrb[3].mxu0  ;;  %7906 = vmatmul.mubr.msk.f32.gmra.mrb[44].mxu0 %vm262_vm1, %v9889_v15 }
 0x1af   : > { %7806 = vmatmul.mubr.msk.f32.gmra.mrb[44].mxu1 %vm262_vm1, %v6339_v13  ;;  %v7988_v27 = vadd.f32 %v9861_v8, %v2524_v25  ;;  %7908 = vmatprep.mubr.msk.f32.mxu0 %vm262_vm1, %v9895_v19  ;;  %v6351_v25 = vld [vmem:[%s8609_s27 + $0x158] sm:$0xff] }
 0x1b0   : > { %7808 = vmatprep.mubr.msk.f32.mxu1 %vm262_vm1, %v6340_v17  ;;  %5579 = vst.msk [vmem:[%s9877_s7 + $0x18] sm:$0xff] %vm262_vm1, %v7987_v23 }
 0x1b1   : > { %5578 = vst.msk [vmem:[%s9877_s7 + $0x10] sm:$0xff] %vm262_vm1, %v7988_v27  ;;  %v7495_v35 = vpop.f32.mrb[4].mxu0  ;;  %v10009_v27 = vld [vmem:[%s8609_s27 + $0x159] sm:$0xff] }
 0x1b2   : > { %v7989_v36 = vadd.f32 %v7495_v35, %v9861_v8  ;;  %v2534_v37 = vpop.f32.mrb[5].mxu0  ;;  %7909 = vmatmul.mubr.msk.f32.gmra.mrb[46].mxu0 %vm262_vm1, %v9909_v31 }
 0x1b3   : > { %7809 = vmatmul.mubr.msk.f32.gmra.mrb[46].mxu1 %vm262_vm1, %v6341_v29  ;;  %v7990_v38 = vadd.f32 %v9861_v8, %v2534_v37  ;;  %7911 = vmatprep.mubr.msk.f32.mxu0 %vm262_vm1, %v9915_v34  ;;  %v6352_v29 = vld [vmem:[%s8609_s27 + $0x168] sm:$0xff] }
 0x1b4   : > { %7811 = vmatprep.mubr.msk.f32.mxu1 %vm262_vm1, %v6342_v33  ;;  %5581 = vst.msk [vmem:[%s9877_s7 + $0x28] sm:$0xff] %vm262_vm1, %v7989_v36  ;;  %v10015_v33 = vld [vmem:[%s8609_s27 + $0x169] sm:$0xff] }
 0x1b5   : > { %5580 = vst.msk [vmem:[%s9877_s7 + $0x20] sm:$0xff] %vm262_vm1, %v7990_v38  ;;  %v7498_v43 = vpop.f32.mrb[6].mxu0 }
 0x1b6   : > { %v7991_v44 = vadd.f32 %v7498_v43, %v9861_v8  ;;  %v2544_v45 = vpop.f32.mrb[7].mxu0  ;;  %7912 = vmatmul.mubr.msk.f32.gmra.mrb[48].mxu0 %vm262_vm1, %v9929_v40 }
 0x1b7   : > { %7812 = vmatmul.mubr.msk.f32.gmra.mrb[48].mxu1 %vm262_vm1, %v6343_v39  ;;  %v7992_v46 = vadd.f32 %v9861_v8, %v2544_v45  ;;  %7914 = vmatprep.mubr.msk.f32.mxu0 %vm262_vm1, %v9935_v42  ;;  %v6353_v39 = vld [vmem:[%s8609_s27 + $0x170] sm:$0xff] }
 0x1b8   : > { %7814 = vmatprep.mubr.msk.f32.mxu1 %vm262_vm1, %v6344_v41  ;;  %5583 = vst.msk [vmem:[%s9877_s7 + $0x38] sm:$0xff] %vm262_vm1, %v7991_v44  ;;  %v10029_v41 = vld [vmem:[%s8609_s27 + $0x171] sm:$0xff] }
 0x1b9   : > { %5582 = vst.msk [vmem:[%s9877_s7 + $0x30] sm:$0xff] %vm262_vm1, %v7992_v46  ;;  %v7501_v54 = vpop.f32.mrb[8].mxu0 }
 0x1ba   : > { %v7993_v56 = vadd.f32 %v7501_v54, %v9861_v8  ;;  %v2554_v58 = vpop.f32.mrb[9].mxu0  ;;  %7915 = vmatmul.mubr.msk.f32.gmra.mrb[50].mxu0 %vm262_vm1, %v9949_v48 }
 0x1bb   : > { %7815 = vmatmul.mubr.msk.f32.gmra.mrb[50].mxu1 %vm262_vm1, %v6345_v47  ;;  %v7994_v60 = vadd.f32 %v9861_v8, %v2554_v58  ;;  %7917 = vmatprep.mubr.msk.f32.mxu0 %vm262_vm1, %v9955_v52  ;;  %v6356_v47 = vld [vmem:[%s8609_s27 + $0x198] sm:$0xff] }
 0x1bc   : > { %7817 = vmatprep.mubr.msk.f32.mxu1 %vm262_vm1, %v6346_v50  ;;  %5585 = vst.msk [vmem:[%s9877_s7 + $0x48] sm:$0xff] %vm262_vm1, %v7993_v56  ;;  %v10048_v50 = vld [vmem:[%s8609_s27 + $0x199] sm:$0xff] }
 0x1bd   : > { %5584 = vst.msk [vmem:[%s9877_s7 + $0x40] sm:$0xff] %vm262_vm1, %v7994_v60  ;;  %v7504_v62 = vpop.f32.mrb[10].mxu0  ;;  %v6357_v60 = vld [vmem:[%s8609_s27 + $0x1a0] sm:$0xff] }
 0x1be   : > { %v7995_v11 = vadd.f32 %v7504_v62, %v9861_v8  ;;  %v2564_v12 = vpop.f32.mrb[11].mxu0  ;;  %7918 = vmatmul.mubr.msk.f32.gmra.mrb[52].mxu0 %vm262_vm1, %v9969_v1 }
 0x1bf   : > { %7818 = vmatmul.mubr.msk.f32.gmra.mrb[52].mxu1 %vm262_vm1, %v6347_v63  ;;  %v7996_v18 = vadd.f32 %v9861_v8, %v2564_v12  ;;  %7920 = vmatprep.mubr.msk.f32.mxu0 %vm262_vm1, %v9975_v5  ;;  %v10063_v63 = vld [vmem:[%s8609_s27 + $0x1a1] sm:$0xff] }
 0x1c0   : > { %7820 = vmatprep.mubr.msk.f32.mxu1 %vm262_vm1, %v6348_v4  ;;  %5587 = vst.msk [vmem:[%s9877_s7 + $0x58] sm:$0xff] %vm262_vm1, %v7995_v11 }
 0x1c1   : > { %5586 = vst.msk [vmem:[%s9877_s7 + $0x50] sm:$0xff] %vm262_vm1, %v7996_v18  ;;  %v7507_v13 = vpop.f32.mrb[12].mxu0  ;;  %v6493_v18 = vld [vmem:[%s8609_s27 + $0x3a] sm:$0xff] }
 0x1c2   : > { %v7997_v17 = vadd.f32 %v7507_v13, %v9861_v8  ;;  %v2574_v21 = vpop.f32.mrb[13].mxu0  ;;  %7921 = vmatmul.mubr.msk.f32.gmra.mrb[54].mxu0 %vm262_vm1, %v9989_v30 }
 0x1c3   : > { %7821 = vmatmul.mubr.msk.f32.gmra.mrb[54].mxu1 %vm262_vm1, %v6349_v24  ;;  %v7998_v23 = vadd.f32 %v9861_v8, %v2574_v21  ;;  %7923 = vmatprep.mubr.msk.f32.mxu0 %vm262_vm1, %v9995_v9  ;;  %v6494_v24 = vld [vmem:[%s8609_s27 + $0x4a] sm:$0xff]  ;;  %v6495_v21 = vld [vmem:[%s8609_s27 + $0x52] sm:$0xff] }
 0x1c4   : > { %7823 = vmatprep.mubr.msk.f32.mxu1 %vm262_vm1, %v6350_v32  ;;  %5589 = vst.msk [vmem:[%s9877_s7 + $0x68] sm:$0xff] %vm262_vm1, %v7997_v17 }
 0x1c5   : > { %5588 = vst.msk [vmem:[%s9877_s7 + $0x60] sm:$0xff] %vm262_vm1, %v7998_v23  ;;  %v7510_v35 = vpop.f32.mrb[14].mxu0  ;;  %v6496_v23 = vld [vmem:[%s8609_s27 + $0x62] sm:$0xff] }
 0x1c6   : > { %v7999_v36 = vadd.f32 %v7510_v35, %v9861_v8  ;;  %v2584_v37 = vpop.f32.mrb[15].mxu0  ;;  %7924 = vmatmul.mubr.msk.f32.gmra.mrb[56].mxu0 %vm262_vm1, %v10009_v27  ;;  %v6497_v35 = vld [vmem:[%s8609_s27 + $0x6a] sm:$0xff] }
 0x1c7   : > { %7824 = vmatmul.mubr.msk.f32.gmra.mrb[56].mxu1 %vm262_vm1, %v6351_v25  ;;  %v8000_v38 = vadd.f32 %v9861_v8, %v2584_v37  ;;  %7926 = vmatprep.mubr.msk.f32.mxu0 %vm262_vm1, %v10015_v33 }
 0x1c8   : > { %7826 = vmatprep.mubr.msk.f32.mxu1 %vm262_vm1, %v6352_v29  ;;  %5591 = vst.msk [vmem:[%s9877_s7 + $0x78] sm:$0xff] %vm262_vm1, %v7999_v36  ;;  %v6498_v36 = vld [vmem:[%s8609_s27 + $0x7a] sm:$0xff] }
 0x1c9   : > { %5590 = vst.msk [vmem:[%s9877_s7 + $0x70] sm:$0xff] %vm262_vm1, %v8000_v38  ;;  %v7513_v43 = vpop.f32.mrb[16].mxu0 }
 0x1ca   : > { %v8001_v44 = vadd.f32 %v7513_v43, %v9861_v8  ;;  %v2594_v45 = vpop.f32.mrb[17].mxu0  ;;  %7927 = vmatmul.mubr.msk.f32.gmra.mrb[58].mxu0 %vm262_vm1, %v10029_v41  ;;  %v6500_v43 = vld [vmem:[%s8609_s27 + $0x92] sm:$0xff] }
 0x1cb   : > { %7827 = vmatmul.mubr.msk.f32.gmra.mrb[58].mxu1 %vm262_vm1, %v6353_v39  ;;  %v8002_v46 = vadd.f32 %v9861_v8, %v2594_v45  ;;  %7929 = vmatprep.mubr.msk.f32.mxu0 %vm262_vm1, %v9464_v26  ;;  %v6499_v39 = vld [vmem:[%s8609_s27 + $0x82] sm:$0xff] }
 0x1cc   : > { %7829 = vmatprep.mubr.msk.f32.mxu1 %vm262_vm1, %v9312_v16  ;;  %5593 = vst.msk [vmem:[%s9877_s7 + $0x88] sm:$0xff] %vm262_vm1, %v8001_v44 }
 0x1cd   : > { %5592 = vst.msk [vmem:[%s9877_s7 + $0x80] sm:$0xff] %vm262_vm1, %v8002_v46  ;;  %v7516_v54 = vpop.f32.mrb[18].mxu0  ;;  %v6501_v46 = vld [vmem:[%s8609_s27 + $0x9a] sm:$0xff] }
 0x1ce   : > { %v8003_v56 = vadd.f32 %v7516_v54, %v9861_v8  ;;  %v2604_v58 = vpop.f32.mrb[19].mxu0  ;;  %7930 = vmatmul.mubr.msk.f32.gmra.mrb[60].mxu0 %vm262_vm1, %v9475_v28 }
 0x1cf   : > { %7830 = vmatmul.mubr.msk.f32.gmra.mrb[60].mxu1 %vm262_vm1, %v9323_v20  ;;  %v8004_v16 = vadd.f32 %v9861_v8, %v2604_v58  ;;  %7932 = vmatprep.mubr.msk.f32.mxu0 %vm262_vm1, %v10048_v50  ;;  %v6492_v20 = vld [vmem:[%s8609_s27 + $0x32] sm:$0xff] }
 0x1d0   : > { %7832 = vmatprep.mubr.msk.f32.mxu1 %vm262_vm1, %v6356_v47  ;;  %5595 = vst.msk [vmem:[%s9877_s7 + $0x98] sm:$0xff] %vm262_vm1, %v8003_v56  ;;  %v6502_v47 = vld [vmem:[%s8609_s27 + $0xaa] sm:$0xff]  ;;  %v6503_v58 = vld [vmem:[%s8609_s27 + $0xb2] sm:$0xff] }
 0x1d1   : > { %5594 = vst.msk [vmem:[%s9877_s7 + $0x90] sm:$0xff] %vm262_vm1, %v8004_v16  ;;  %v7519_v4 = vpop.f32.mrb[20].mxu0  ;;  %v6504_v16 = vld [vmem:[%s8609_s27 + $0xc2] sm:$0xff] }
 0x1d2   : > { %v8005_v62 = vadd.f32 %v7519_v4, %v9861_v8  ;;  %v2614_v11 = vpop.f32.mrb[21].mxu0  ;;  %7933 = vmatmul.mubr.msk.f32.gmra.mrb[62].mxu0 %vm262_vm1, %v10063_v63 }
 0x1d3   : > { %7833 = vmatmul.mubr.msk.f32.gmra.mrb[62].mxu1 %vm262_vm1, %v6357_v60  ;;  %v8006_v12 = vadd.f32 %v9861_v8, %v2614_v11  ;;  %7937 = vmatprep.mubr.msk.f32.mxu0 %vm262_vm1, %v6492_v20  ;;  %v6508_v60 = vld [vmem:[%s8609_s27 + $0xf2] sm:$0xff] }
 0x1d4   : > { %7837 = vmatprep.mubr.msk.f32.mxu1 %vm262_vm1, %v9777_v53  ;;  %5597 = vst.msk [vmem:[%s9877_s7 + $0xa8] sm:$0xff] %vm262_vm1, %v8005_v62 }
 0x1d5   : > { %5596 = vst.msk [vmem:[%s9877_s7 + $0xa0] sm:$0xff] %vm262_vm1, %v8006_v12  ;;  %v7522_v32 = vpop.f32.mrb[22].mxu0 }
 0x1d6   : > { %v8007_v13 = vadd.f32 %v7522_v32, %v9861_v8  ;;  %v2624_v17 = vpop.f32.mrb[23].mxu0  ;;  %7938 = vmatmul.mubr.msk.f32.vlgmr.msra.gmra.mrb[32].mxu0 %vm262_vm1, %v6493_v18 }
 0x1d7   : > { %7838 = vmatmul.mubr.msk.f32.vlgmr.msra.gmra.mrb[32].mxu1 %vm262_vm1, %v9788_v55  ;;  %v8008_v53 = vadd.f32 %v9861_v8, %v2624_v17  ;;  %7940 = vmatprep.mubr.msk.f32.mxu0 %vm262_vm1, %v6494_v24 }
 0x1d8   : > { %7840 = vmatprep.mubr.msk.f32.mxu1 %vm262_vm1, %v9792_v57  ;;  %5599 = vst.msk [vmem:[%s9877_s7 + $0xb8] sm:$0xff] %vm262_vm1, %v8007_v13 }
 0x1d9   : > { %5598 = vst.msk [vmem:[%s9877_s7 + $0xb0] sm:$0xff] %vm262_vm1, %v8008_v53  ;;  %v7525_v55 = vpop.f32.mrb[24].mxu0 }
 0x1da   : > { %v8009_v25 = vadd.f32 %v7525_v55, %v9861_v8  ;;  %v2634_v29 = vpop.f32.mrb[25].mxu0  ;;  %7941 = vmatmul.mubr.msk.f32.gmra.mrb[34].mxu0 %vm262_vm1, %v6495_v21 }
 0x1db   : > { %7841 = vmatmul.mubr.msk.f32.gmra.mrb[34].mxu1 %vm262_vm1, %v9803_v59  ;;  %v8010_v57 = vadd.f32 %v9861_v8, %v2634_v29  ;;  %7943 = vmatprep.mubr.msk.f32.mxu0 %vm262_vm1, %v6496_v23 }
 0x1dc   : > { %7843 = vmatprep.mubr.msk.f32.mxu1 %vm262_vm1, %v9810_v61  ;;  %5601 = vst.msk [vmem:[%s9877_s7 + $0xc8] sm:$0xff] %vm262_vm1, %v8009_v25 }
 0x1dd   : > { %5600 = vst.msk [vmem:[%s9877_s7 + $0xc0] sm:$0xff] %vm262_vm1, %v8010_v57  ;;  %v7528_v59 = vpop.f32.mrb[26].mxu0 }
 0x1de   : > { %v8011_v37 = vadd.f32 %v7528_v59, %v9861_v8  ;;  %v2644_v38 = vpop.f32.mrb[27].mxu0  ;;  %7944 = vmatmul.mubr.msk.f32.gmra.mrb[36].mxu0 %vm262_vm1, %v6497_v35 }
 0x1df   : > { %7844 = vmatmul.mubr.msk.f32.gmra.mrb[36].mxu1 %vm262_vm1, %v9820_v0  ;;  %v8012_v61 = vadd.f32 %v9861_v8, %v2644_v38  ;;  %7946 = vmatprep.mubr.msk.f32.mxu0 %vm262_vm1, %v6498_v36 }
 0x1e0   : > { %7846 = vmatprep.mubr.msk.f32.mxu1 %vm262_vm1, %v9824_v3  ;;  %5603 = vst.msk [vmem:[%s9877_s7 + $0xd8] sm:$0xff] %vm262_vm1, %v8011_v37 }
 0x1e1   : > { %5602 = vst.msk [vmem:[%s9877_s7 + $0xd0] sm:$0xff] %vm262_vm1, %v8012_v61  ;;  %v7531_v0 = vpop.f32.mrb[28].mxu0 }
 0x1e2   : > { %v8013_v44 = vadd.f32 %v7531_v0, %v9861_v8  ;;  %v2654_v45 = vpop.f32.mrb[29].mxu0  ;;  %7947 = vmatmul.mubr.msk.f32.gmra.mrb[38].mxu0 %vm262_vm1, %v6499_v39 }
 0x1e3   : > { %7847 = vmatmul.mubr.msk.f32.gmra.mrb[38].mxu1 %vm262_vm1, %v9834_v6  ;;  %v8014_v3 = vadd.f32 %v9861_v8, %v2654_v45  ;;  %7949 = vmatprep.mubr.msk.f32.mxu0 %vm262_vm1, %v6500_v43 }
 0x1e4   : > { %7849 = vmatprep.mubr.msk.f32.mxu1 %vm262_vm1, %v9838_v7  ;;  %5605 = vst.msk [vmem:[%s9877_s7 + $0xe8] sm:$0xff] %vm262_vm1, %v8013_v44 }
 0x1e5   : > { %5604 = vst.msk [vmem:[%s9877_s7 + $0xe0] sm:$0xff] %vm262_vm1, %v8014_v3  ;;  %v7534_v6 = vpop.f32.mrb[30].mxu0 }
 0x1e6   : > { %v8015_v54 = vadd.f32 %v7534_v6, %v9861_v8  ;;  %v2664_v56 = vpop.f32.mrb[31].mxu0  ;;  %7950 = vmatmul.mubr.msk.f32.gmra.mrb[40].mxu0 %vm262_vm1, %v6501_v46 }
 0x1e7   : > { %7850 = vmatmul.mubr.msk.f32.gmra.mrb[40].mxu1 %vm262_vm1, %v9848_v10  ;;  %v8016_v7 = vadd.f32 %v9861_v8, %v2664_v56  ;;  %7952 = vmatprep.mubr.msk.f32.mxu0 %vm262_vm1, %v6502_v47  ;;  %v6505_v10 = vld [vmem:[%s8609_s27 + $0xca] sm:$0xff] }
 0x1e8   : > { %7852 = vmatprep.mubr.msk.f32.mxu1 %vm262_vm1, %v9852_v2  ;;  %5607 = vst.msk [vmem:[%s9877_s7 + $0xf8] sm:$0xff] %vm262_vm1, %v8015_v54  ;;  %v6506_v2 = vld [vmem:[%s8609_s27 + $0xda] sm:$0xff] }
 0x1e9   : > { %5606 = vst.msk [vmem:[%s9877_s7 + $0xf0] sm:$0xff] %vm262_vm1, %v8016_v7 }
 0x1ea   : > { %7953 = vmatmul.mubr.msk.f32.gmra.mrb[42].mxu0 %vm262_vm1, %v6503_v58 }
 0x1eb   : > { %7853 = vmatmul.mubr.msk.f32.gmra.mrb[42].mxu1 %vm262_vm1, %v9868_v14  ;;  %7955 = vmatprep.mubr.msk.f32.mxu0 %vm262_vm1, %v6504_v16  ;;  %v6507_v14 = vld [vmem:[%s8609_s27 + $0xe2] sm:$0xff] }
 0x1ec   : > { %7855 = vmatprep.mubr.msk.f32.mxu1 %vm262_vm1, %v9872_v22  ;;  %v6509_v22 = vld [vmem:[%s8609_s27 + $0xfa] sm:$0xff] }
 0x1ee   : > { %7956 = vmatmul.mubr.msk.f32.gmra.mrb[44].mxu0 %vm262_vm1, %v6505_v10 }
 0x1ef   : > { %7856 = vmatmul.mubr.msk.f32.gmra.mrb[44].mxu1 %vm262_vm1, %v9889_v15  ;;  %7958 = vmatprep.mubr.msk.f32.mxu0 %vm262_vm1, %v6506_v2  ;;  %v6510_v15 = vld [vmem:[%s8609_s27 + $0x10a] sm:$0xff] }
 0x1f0   : > { %7858 = vmatprep.mubr.msk.f32.mxu1 %vm262_vm1, %v9895_v19  ;;  %v6511_v19 = vld [vmem:[%s8609_s27 + $0x112] sm:$0xff] }
 0x1f2   : > { %7959 = vmatmul.mubr.msk.f32.gmra.mrb[46].mxu0 %vm262_vm1, %v6507_v14 }
 0x1f3   : > { %7859 = vmatmul.mubr.msk.f32.gmra.mrb[46].mxu1 %vm262_vm1, %v9909_v31  ;;  %7961 = vmatprep.mubr.msk.f32.mxu0 %vm262_vm1, %v6508_v60  ;;  %v6512_v31 = vld [vmem:[%s8609_s27 + $0x122] sm:$0xff] }
 0x1f4   : > { %7861 = vmatprep.mubr.msk.f32.mxu1 %vm262_vm1, %v9915_v34  ;;  %v6513_v34 = vld [vmem:[%s8609_s27 + $0x12a] sm:$0xff] }
 0x1f6   : > { %7962 = vmatmul.mubr.msk.f32.gmra.mrb[48].mxu0 %vm262_vm1, %v6509_v22 }
 0x1f7   : > { %7862 = vmatmul.mubr.msk.f32.gmra.mrb[48].mxu1 %vm262_vm1, %v9929_v40  ;;  %7964 = vmatprep.mubr.msk.f32.mxu0 %vm262_vm1, %v6510_v15  ;;  %v6514_v40 = vld [vmem:[%s8609_s27 + $0x13a] sm:$0xff] }
 0x1f8   : > { %7864 = vmatprep.mubr.msk.f32.mxu1 %vm262_vm1, %v9935_v42  ;;  %v6515_v42 = vld [vmem:[%s8609_s27 + $0x142] sm:$0xff] }
 0x1fa   : > { %7965 = vmatmul.mubr.msk.f32.gmra.mrb[50].mxu0 %vm262_vm1, %v6511_v19 }
 0x1fb   : > { %7865 = vmatmul.mubr.msk.f32.gmra.mrb[50].mxu1 %vm262_vm1, %v9949_v48  ;;  %7967 = vmatprep.mubr.msk.f32.mxu0 %vm262_vm1, %v6512_v31  ;;  %v6516_v48 = vld [vmem:[%s8609_s27 + $0x152] sm:$0xff] }
 0x1fc   : > { %7867 = vmatprep.mubr.msk.f32.mxu1 %vm262_vm1, %v9955_v52  ;;  %v6517_v52 = vld [vmem:[%s8609_s27 + $0x15a] sm:$0xff] }
 0x1fe   : > { %7968 = vmatmul.mubr.msk.f32.gmra.mrb[52].mxu0 %vm262_vm1, %v6513_v34 }
 0x1ff   : > { %7868 = vmatmul.mubr.msk.f32.gmra.mrb[52].mxu1 %vm262_vm1, %v9969_v1  ;;  %7970 = vmatprep.mubr.msk.f32.mxu0 %vm262_vm1, %v6514_v40  ;;  %v6518_v1 = vld [vmem:[%s8609_s27 + $0x16a] sm:$0xff] }
 0x200   : > { %7870 = vmatprep.mubr.msk.f32.mxu1 %vm262_vm1, %v9975_v5  ;;  %v6519_v5 = vld [vmem:[%s8609_s27 + $0x172] sm:$0xff] }
 0x202   : > { %7971 = vmatmul.mubr.msk.f32.gmra.mrb[54].mxu0 %vm262_vm1, %v6515_v42 }
 0x203   : > { %7871 = vmatmul.mubr.msk.f32.gmra.mrb[54].mxu1 %vm262_vm1, %v9989_v30  ;;  %7973 = vmatprep.mubr.msk.f32.mxu0 %vm262_vm1, %v6516_v48  ;;  %v6522_v30 = vld [vmem:[%s8609_s27 + $0x19a] sm:$0xff] }
 0x204   : > { %7873 = vmatprep.mubr.msk.f32.mxu1 %vm262_vm1, %v9995_v9  ;;  %v6523_v9 = vld [vmem:[%s8609_s27 + $0x1a2] sm:$0xff] }
 0x206   : > { %7974 = vmatmul.mubr.msk.f32.gmra.mrb[56].mxu0 %vm262_vm1, %v6517_v52 }
 0x207   : > { %7874 = vmatmul.mubr.msk.f32.gmra.mrb[56].mxu1 %vm262_vm1, %v10009_v27  ;;  %7976 = vmatprep.mubr.msk.f32.mxu0 %vm262_vm1, %v6518_v1 }
 0x208   : > { %7876 = vmatprep.mubr.msk.f32.mxu1 %vm262_vm1, %v10015_v33 }
 0x20a   : > { %7977 = vmatmul.mubr.msk.f32.gmra.mrb[58].mxu0 %vm262_vm1, %v6519_v5 }
 0x20b   : > { %7877 = vmatmul.mubr.msk.f32.gmra.mrb[58].mxu1 %vm262_vm1, %v10029_v41  ;;  %7979 = vmatprep.mubr.msk.f32.mxu0 %vm262_vm1, %v9762_v49 }
 0x20c   : > { %7879 = vmatprep.mubr.msk.f32.mxu1 %vm262_vm1, %v9464_v26 }
 0x20e   : > { %7980 = vmatmul.mubr.msk.f32.gmra.mrb[60].mxu0 %vm262_vm1, %v9773_v51 }
 0x20f   : > { %7880 = vmatmul.mubr.msk.f32.gmra.mrb[60].mxu1 %vm262_vm1, %v9475_v28  ;;  %7982 = vmatprep.mubr.msk.f32.mxu0 %vm262_vm1, %v6522_v30 }
 0x210   : > { %7882 = vmatprep.mubr.msk.f32.mxu1 %vm262_vm1, %v10048_v50 }
 0x212   : > { %7983 = vmatmul.mubr.msk.f32.gmra.mrb[62].mxu0 %vm262_vm1, %v6523_v9 }
 0x213   : > { %7883 = vmatmul.mubr.msk.f32.gmra.mrb[62].mxu1 %vm262_vm1, %v10063_v63 }
 0x22a   : > { %v7689_v26 = vpop.f32.mrb[0].mxu1 }
 0x22b   : > { %v8017_v28 = vadd.f32 %v7689_v26, %v9861_v8  ;;  %v3690_v49 = vpop.f32.mrb[1].mxu1 }
 0x22c   : > { %v8018_v51 = vadd.f32 %v9861_v8, %v3690_v49 }
 0x22d   : > { %6559 = vst.msk [vmem:[%s9877_s7 + $0x108] sm:$0xff] %vm262_vm1, %v8017_v28 }
 0x22e   : > { %6558 = vst.msk [vmem:[%s9877_s7 + $0x100] sm:$0xff] %vm262_vm1, %v8018_v51  ;;  %v7692_v27 = vpop.f32.mrb[2].mxu1 }
 0x22f   : > { %v8019_v33 = vadd.f32 %v7692_v27, %v9861_v8  ;;  %v3700_v41 = vpop.f32.mrb[3].mxu1 }
 0x230   : > { %v8020_v50 = vadd.f32 %v9861_v8, %v3700_v41 }
 0x231   : > { %6561 = vst.msk [vmem:[%s9877_s7 + $0x118] sm:$0xff] %vm262_vm1, %v8019_v33 }
 0x232   : > { %6560 = vst.msk [vmem:[%s9877_s7 + $0x110] sm:$0xff] %vm262_vm1, %v8020_v50  ;;  %v7695_v63 = vpop.f32.mrb[4].mxu1 }
 0x233   : > { %v8021_v20 = vadd.f32 %v7695_v63, %v9861_v8  ;;  %v3710_v4 = vpop.f32.mrb[5].mxu1 }
 0x234   : > { %v8022_v62 = vadd.f32 %v9861_v8, %v3710_v4 }
 0x235   : > { %6563 = vst.msk [vmem:[%s9877_s7 + $0x128] sm:$0xff] %vm262_vm1, %v8021_v20 }
 0x236   : > { %6562 = vst.msk [vmem:[%s9877_s7 + $0x120] sm:$0xff] %vm262_vm1, %v8022_v62  ;;  %v7698_v11 = vpop.f32.mrb[6].mxu1 }
 0x237   : > { %v8023_v12 = vadd.f32 %v7698_v11, %v9861_v8  ;;  %v3720_v18 = vpop.f32.mrb[7].mxu1 }
 0x238   : > { %v8024_v24 = vadd.f32 %v9861_v8, %v3720_v18 }
 0x239   : > { %6565 = vst.msk [vmem:[%s9877_s7 + $0x138] sm:$0xff] %vm262_vm1, %v8023_v12 }
 0x23a   : > { %6564 = vst.msk [vmem:[%s9877_s7 + $0x130] sm:$0xff] %vm262_vm1, %v8024_v24  ;;  %v7701_v32 = vpop.f32.mrb[8].mxu1 }
 0x23b   : > { %v8025_v13 = vadd.f32 %v7701_v32, %v9861_v8  ;;  %v3730_v17 = vpop.f32.mrb[9].mxu1 }
 0x23c   : > { %v8026_v53 = vadd.f32 %v9861_v8, %v3730_v17 }
 0x23d   : > { %6567 = vst.msk [vmem:[%s9877_s7 + $0x148] sm:$0xff] %vm262_vm1, %v8025_v13 }
 0x23e   : > { %6566 = vst.msk [vmem:[%s9877_s7 + $0x140] sm:$0xff] %vm262_vm1, %v8026_v53  ;;  %v7704_v21 = vpop.f32.mrb[10].mxu1 }
 0x23f   : > { %v8027_v23 = vadd.f32 %v7704_v21, %v9861_v8  ;;  %v3740_v55 = vpop.f32.mrb[11].mxu1 }
 0x240   : > { %v8028_v25 = vadd.f32 %v9861_v8, %v3740_v55 }
 0x241   : > { %6569 = vst.msk [vmem:[%s9877_s7 + $0x158] sm:$0xff] %vm262_vm1, %v8027_v23 }
 0x242   : > { %6568 = vst.msk [vmem:[%s9877_s7 + $0x150] sm:$0xff] %vm262_vm1, %v8028_v25  ;;  %v7707_v29 = vpop.f32.mrb[12].mxu1 }
 0x243   : > { %v8029_v57 = vadd.f32 %v7707_v29, %v9861_v8  ;;  %v3750_v35 = vpop.f32.mrb[13].mxu1 }
 0x244   : > { %v8030_v36 = vadd.f32 %v9861_v8, %v3750_v35 }
 0x245   : > { %6571 = vst.msk [vmem:[%s9877_s7 + $0x168] sm:$0xff] %vm262_vm1, %v8029_v57 }
 0x246   : > { %6570 = vst.msk [vmem:[%s9877_s7 + $0x160] sm:$0xff] %vm262_vm1, %v8030_v36  ;;  %v7710_v59 = vpop.f32.mrb[14].mxu1 }
 0x247   : > { %v8031_v37 = vadd.f32 %v7710_v59, %v9861_v8  ;;  %v3760_v38 = vpop.f32.mrb[15].mxu1 }
 0x248   : > { %v8032_v61 = vadd.f32 %v9861_v8, %v3760_v38 }
 0x249   : > { %6573 = vst.msk [vmem:[%s9877_s7 + $0x178] sm:$0xff] %vm262_vm1, %v8031_v37 }
 0x24a   : > { %6572 = vst.msk [vmem:[%s9877_s7 + $0x170] sm:$0xff] %vm262_vm1, %v8032_v61  ;;  %v7713_v39 = vpop.f32.mrb[16].mxu1 }
 0x24b   : > { %v8033_v43 = vadd.f32 %v7713_v39, %v9861_v8  ;;  %v3770_v0 = vpop.f32.mrb[17].mxu1 }
 0x24c   : > { %v8034_v44 = vadd.f32 %v9861_v8, %v3770_v0 }
 0x24d   : > { %6575 = vst.msk [vmem:[%s9877_s7 + $0x188] sm:$0xff] %vm262_vm1, %v8033_v43 }
 0x24e   : > { %6574 = vst.msk [vmem:[%s9877_s7 + $0x180] sm:$0xff] %vm262_vm1, %v8034_v44  ;;  %v7716_v45 = vpop.f32.mrb[18].mxu1 }
 0x24f   : > { %v8035_v3 = vadd.f32 %v7716_v45, %v9861_v8  ;;  %v3780_v46 = vpop.f32.mrb[19].mxu1 }
 0x250   : > { %v8036_v47 = vadd.f32 %v9861_v8, %v3780_v46 }
 0x251   : > { %6577 = vst.msk [vmem:[%s9877_s7 + $0x198] sm:$0xff] %vm262_vm1, %v8035_v3 }
 0x252   : > { %6576 = vst.msk [vmem:[%s9877_s7 + $0x190] sm:$0xff] %vm262_vm1, %v8036_v47  ;;  %v7719_v6 = vpop.f32.mrb[20].mxu1 }
 0x253   : > { %v8037_v54 = vadd.f32 %v7719_v6, %v9861_v8  ;;  %v3790_v56 = vpop.f32.mrb[21].mxu1 }
 0x254   : > { %v8038_v7 = vadd.f32 %v9861_v8, %v3790_v56 }
 0x255   : > { %6579 = vst.msk [vmem:[%s9877_s7 + $0x1a8] sm:$0xff] %vm262_vm1, %v8037_v54 }
 0x256   : > { %6578 = vst.msk [vmem:[%s9877_s7 + $0x1a0] sm:$0xff] %vm262_vm1, %v8038_v7  ;;  %v7722_v58 = vpop.f32.mrb[22].mxu1 }
 0x257   : > { %v8039_v16 = vadd.f32 %v7722_v58, %v9861_v8  ;;  %v3800_v10 = vpop.f32.mrb[23].mxu1 }
 0x258   : > { %v8040_v2 = vadd.f32 %v9861_v8, %v3800_v10 }
 0x259   : > { %6581 = vst.msk [vmem:[%s9877_s7 + $0x1b8] sm:$0xff] %vm262_vm1, %v8039_v16 }
 0x25a   : > { %6580 = vst.msk [vmem:[%s9877_s7 + $0x1b0] sm:$0xff] %vm262_vm1, %v8040_v2  ;;  %v7725_v14 = vpop.f32.mrb[24].mxu1 }
 0x25b   : > { %v8041_v60 = vadd.f32 %v7725_v14, %v9861_v8  ;;  %v3810_v22 = vpop.f32.mrb[25].mxu1 }
 0x25c   : > { %v8042_v15 = vadd.f32 %v9861_v8, %v3810_v22 }
 0x25d   : > { %6583 = vst.msk [vmem:[%s9877_s7 + $0x1c8] sm:$0xff] %vm262_vm1, %v8041_v60 }
 0x25e   : > { %6582 = vst.msk [vmem:[%s9877_s7 + $0x1c0] sm:$0xff] %vm262_vm1, %v8042_v15  ;;  %v7728_v19 = vpop.f32.mrb[26].mxu1 }
 0x25f   : > { %v8043_v31 = vadd.f32 %v7728_v19, %v9861_v8  ;;  %v3820_v34 = vpop.f32.mrb[27].mxu1 }
 0x260   : > { %v8044_v40 = vadd.f32 %v9861_v8, %v3820_v34 }
 0x261   : > { %6585 = vst.msk [vmem:[%s9877_s7 + $0x1d8] sm:$0xff] %vm262_vm1, %v8043_v31 }
 0x262   : > { %6584 = vst.msk [vmem:[%s9877_s7 + $0x1d0] sm:$0xff] %vm262_vm1, %v8044_v40  ;;  %v7731_v42 = vpop.f32.mrb[28].mxu1 }
 0x263   : > { %v8045_v48 = vadd.f32 %v7731_v42, %v9861_v8  ;;  %v3830_v52 = vpop.f32.mrb[29].mxu1 }
 0x264   : > { %v8046_v1 = vadd.f32 %v9861_v8, %v3830_v52 }
 0x265   : > { %6587 = vst.msk [vmem:[%s9877_s7 + $0x1e8] sm:$0xff] %vm262_vm1, %v8045_v48 }
 0x266   : > { %6586 = vst.msk [vmem:[%s9877_s7 + $0x1e0] sm:$0xff] %vm262_vm1, %v8046_v1  ;;  %v7734_v5 = vpop.f32.mrb[30].mxu1 }
 0x267   : > { %v8047_v30 = vadd.f32 %v7734_v5, %v9861_v8  ;;  %v3840_v9 = vpop.f32.mrb[31].mxu1 }
 0x268   : > { %v8048_v26 = vadd.f32 %v9861_v8, %v3840_v9 }
 0x269   : > { %6589 = vst.msk [vmem:[%s9877_s7 + $0x1f8] sm:$0xff] %vm262_vm1, %v8047_v30 }
 0x26a   : > { %6588 = vst.msk [vmem:[%s9877_s7 + $0x1f0] sm:$0xff] %vm262_vm1, %v8048_v26 }
 0x2a9   : > { %v7939_v49 = vpop.f32.mrb[32].mxu0 }
 0x2aa   : > { %v7839_v28 = vpop.f32.mrb[32].mxu1  ;;  %v8081_v27 = vadd.f32 %v7939_v49, %v9861_v8  ;;  %v5385_v41 = vpop.f32.mrb[33].mxu0 }
 0x2ab   : > { %v8049_v51 = vadd.f32 %v7839_v28, %v9861_v8  ;;  %v4733_v33 = vpop.f32.mrb[33].mxu1  ;;  %v8082_v63 = vadd.f32 %v9861_v8, %v5385_v41 }
 0x2ac   : > { %v8050_v50 = vadd.f32 %v9861_v8, %v4733_v33  ;;  %6623 = vst.msk [vmem:[%s9877_s7 + $0x308] sm:$0xff] %vm262_vm1, %v8081_v27 }
 0x2ad   : > { %6591 = vst.msk [vmem:[%s9877_s7 + $0x208] sm:$0xff] %vm262_vm1, %v8049_v51  ;;  %6622 = vst.msk [vmem:[%s9877_s7 + $0x300] sm:$0xff] %vm262_vm1, %v8082_v63  ;;  %v7942_v4 = vpop.f32.mrb[34].mxu0 }
 0x2ae   : > { %6590 = vst.msk [vmem:[%s9877_s7 + $0x200] sm:$0xff] %vm262_vm1, %v8050_v50  ;;  %v7842_v20 = vpop.f32.mrb[34].mxu1  ;;  %v8083_v11 = vadd.f32 %v7942_v4, %v9861_v8  ;;  %v5395_v18 = vpop.f32.mrb[35].mxu0 }
 0x2af   : > { %v8051_v62 = vadd.f32 %v7842_v20, %v9861_v8  ;;  %v4743_v12 = vpop.f32.mrb[35].mxu1  ;;  %v8084_v32 = vadd.f32 %v9861_v8, %v5395_v18 }
 0x2b0   : > { %v8052_v24 = vadd.f32 %v9861_v8, %v4743_v12  ;;  %6625 = vst.msk [vmem:[%s9877_s7 + $0x318] sm:$0xff] %vm262_vm1, %v8083_v11 }
 0x2b1   : > { %6593 = vst.msk [vmem:[%s9877_s7 + $0x218] sm:$0xff] %vm262_vm1, %v8051_v62  ;;  %6624 = vst.msk [vmem:[%s9877_s7 + $0x310] sm:$0xff] %vm262_vm1, %v8084_v32  ;;  %v7945_v17 = vpop.f32.mrb[36].mxu0 }
 0x2b2   : > { %6592 = vst.msk [vmem:[%s9877_s7 + $0x210] sm:$0xff] %vm262_vm1, %v8052_v24  ;;  %v7845_v13 = vpop.f32.mrb[36].mxu1  ;;  %v8085_v21 = vadd.f32 %v7945_v17, %v9861_v8  ;;  %v5405_v55 = vpop.f32.mrb[37].mxu0 }
 0x2b3   : > { %v8053_v53 = vadd.f32 %v7845_v13, %v9861_v8  ;;  %v4753_v23 = vpop.f32.mrb[37].mxu1  ;;  %v8086_v29 = vadd.f32 %v9861_v8, %v5405_v55 }
 0x2b4   : > { %v8054_v25 = vadd.f32 %v9861_v8, %v4753_v23  ;;  %6627 = vst.msk [vmem:[%s9877_s7 + $0x328] sm:$0xff] %vm262_vm1, %v8085_v21 }
 0x2b5   : > { %6595 = vst.msk [vmem:[%s9877_s7 + $0x228] sm:$0xff] %vm262_vm1, %v8053_v53  ;;  %6626 = vst.msk [vmem:[%s9877_s7 + $0x320] sm:$0xff] %vm262_vm1, %v8086_v29  ;;  %v7948_v35 = vpop.f32.mrb[38].mxu0 }
 0x2b6   : > { %6594 = vst.msk [vmem:[%s9877_s7 + $0x220] sm:$0xff] %vm262_vm1, %v8054_v25  ;;  %v7848_v57 = vpop.f32.mrb[38].mxu1  ;;  %v8087_v59 = vadd.f32 %v7948_v35, %v9861_v8  ;;  %v5415_v38 = vpop.f32.mrb[39].mxu0 }
 0x2b7   : > { %v8055_v36 = vadd.f32 %v7848_v57, %v9861_v8  ;;  %v4763_v37 = vpop.f32.mrb[39].mxu1  ;;  %v8088_v39 = vadd.f32 %v9861_v8, %v5415_v38 }
 0x2b8   : > { %v8056_v61 = vadd.f32 %v9861_v8, %v4763_v37  ;;  %6629 = vst.msk [vmem:[%s9877_s7 + $0x338] sm:$0xff] %vm262_vm1, %v8087_v59 }
 0x2b9   : > { %6597 = vst.msk [vmem:[%s9877_s7 + $0x238] sm:$0xff] %vm262_vm1, %v8055_v36  ;;  %6628 = vst.msk [vmem:[%s9877_s7 + $0x330] sm:$0xff] %vm262_vm1, %v8088_v39  ;;  %v7951_v0 = vpop.f32.mrb[40].mxu0 }
 0x2ba   : > { %6596 = vst.msk [vmem:[%s9877_s7 + $0x230] sm:$0xff] %vm262_vm1, %v8056_v61  ;;  %v7851_v43 = vpop.f32.mrb[40].mxu1  ;;  %v8089_v45 = vadd.f32 %v7951_v0, %v9861_v8  ;;  %v5425_v46 = vpop.f32.mrb[41].mxu0 }
 0x2bb   : > { %v8057_v44 = vadd.f32 %v7851_v43, %v9861_v8  ;;  %v4773_v3 = vpop.f32.mrb[41].mxu1  ;;  %v8090_v6 = vadd.f32 %v9861_v8, %v5425_v46 }
 0x2bc   : > { %v8058_v47 = vadd.f32 %v9861_v8, %v4773_v3  ;;  %6631 = vst.msk [vmem:[%s9877_s7 + $0x348] sm:$0xff] %vm262_vm1, %v8089_v45  ;;  %v8522_v45 = vld [vmem:[%s10522_s2] ss:$0 sm:$0xff] }
 0x2bd   : > { %6599 = vst.msk [vmem:[%s9877_s7 + $0x248] sm:$0xff] %vm262_vm1, %v8057_v44  ;;  %6630 = vst.msk [vmem:[%s9877_s7 + $0x340] sm:$0xff] %vm262_vm1, %v8090_v6  ;;  %v7954_v56 = vpop.f32.mrb[42].mxu0 }
 0x2be   : > { %6598 = vst.msk [vmem:[%s9877_s7 + $0x240] sm:$0xff] %vm262_vm1, %v8058_v47  ;;  %v7854_v54 = vpop.f32.mrb[42].mxu1  ;;  %v8091_v58 = vadd.f32 %v7954_v56, %v9861_v8  ;;  %v5435_v10 = vpop.f32.mrb[43].mxu0 }
 0x2bf   : > { %v8059_v7 = vadd.f32 %v7854_v54, %v9861_v8  ;;  %v4783_v16 = vpop.f32.mrb[43].mxu1  ;;  %v8092_v14 = vadd.f32 %v9861_v8, %v5435_v10 }
 0x2c0   : > { %v8060_v2 = vadd.f32 %v9861_v8, %v4783_v16  ;;  %6633 = vst.msk [vmem:[%s9877_s7 + $0x358] sm:$0xff] %vm262_vm1, %v8091_v58 }
 0x2c1   : > { %6601 = vst.msk [vmem:[%s9877_s7 + $0x258] sm:$0xff] %vm262_vm1, %v8059_v7  ;;  %6632 = vst.msk [vmem:[%s9877_s7 + $0x350] sm:$0xff] %vm262_vm1, %v8092_v14  ;;  %v7957_v22 = vpop.f32.mrb[44].mxu0 }
 0x2c2   : > { %6600 = vst.msk [vmem:[%s9877_s7 + $0x250] sm:$0xff] %vm262_vm1, %v8060_v2  ;;  %v7857_v60 = vpop.f32.mrb[44].mxu1  ;;  %v8093_v19 = vadd.f32 %v7957_v22, %v9861_v8  ;;  %v5445_v34 = vpop.f32.mrb[45].mxu0 }
 0x2c3   : > { %v8061_v15 = vadd.f32 %v7857_v60, %v9861_v8  ;;  %v4793_v31 = vpop.f32.mrb[45].mxu1  ;;  %v8094_v42 = vadd.f32 %v9861_v8, %v5445_v34 }
 0x2c4   : > { %v8062_v40 = vadd.f32 %v9861_v8, %v4793_v31  ;;  %6635 = vst.msk [vmem:[%s9877_s7 + $0x368] sm:$0xff] %vm262_vm1, %v8093_v19 }
 0x2c5   : > { %6603 = vst.msk [vmem:[%s9877_s7 + $0x268] sm:$0xff] %vm262_vm1, %v8061_v15  ;;  %6634 = vst.msk [vmem:[%s9877_s7 + $0x360] sm:$0xff] %vm262_vm1, %v8094_v42  ;;  %v7960_v52 = vpop.f32.mrb[46].mxu0 }
 0x2c6   : > { %6602 = vst.msk [vmem:[%s9877_s7 + $0x260] sm:$0xff] %vm262_vm1, %v8062_v40  ;;  %v7860_v48 = vpop.f32.mrb[46].mxu1  ;;  %v8095_v5 = vadd.f32 %v7960_v52, %v9861_v8  ;;  %v5455_v9 = vpop.f32.mrb[47].mxu0 }
 0x2c7   : > { %v8063_v1 = vadd.f32 %v7860_v48, %v9861_v8  ;;  %v4803_v30 = vpop.f32.mrb[47].mxu1  ;;  %v8096_v28 = vadd.f32 %v9861_v8, %v5455_v9 }
 0x2c8   : > { %v8064_v26 = vadd.f32 %v9861_v8, %v4803_v30  ;;  %6637 = vst.msk [vmem:[%s9877_s7 + $0x378] sm:$0xff] %vm262_vm1, %v8095_v5 }
 0x2c9   : > { %6605 = vst.msk [vmem:[%s9877_s7 + $0x278] sm:$0xff] %vm262_vm1, %v8063_v1  ;;  %6636 = vst.msk [vmem:[%s9877_s7 + $0x370] sm:$0xff] %vm262_vm1, %v8096_v28  ;;  %v7963_v51 = vpop.f32.mrb[48].mxu0 }
 0x2ca   : > { %6604 = vst.msk [vmem:[%s9877_s7 + $0x270] sm:$0xff] %vm262_vm1, %v8064_v26  ;;  %v7863_v49 = vpop.f32.mrb[48].mxu1  ;;  %v8097_v33 = vadd.f32 %v7963_v51, %v9861_v8  ;;  %v5465_v50 = vpop.f32.mrb[49].mxu0 }
 0x2cb   : > { %v8065_v27 = vadd.f32 %v7863_v49, %v9861_v8  ;;  %v4813_v41 = vpop.f32.mrb[49].mxu1  ;;  %v8098_v20 = vadd.f32 %v9861_v8, %v5465_v50 }
 0x2cc   : > { %v8066_v63 = vadd.f32 %v9861_v8, %v4813_v41  ;;  %6639 = vst.msk [vmem:[%s9877_s7 + $0x388] sm:$0xff] %vm262_vm1, %v8097_v33 }
 0x2cd   : > { %6607 = vst.msk [vmem:[%s9877_s7 + $0x288] sm:$0xff] %vm262_vm1, %v8065_v27  ;;  %6638 = vst.msk [vmem:[%s9877_s7 + $0x380] sm:$0xff] %vm262_vm1, %v8098_v20  ;;  %v7966_v62 = vpop.f32.mrb[50].mxu0 }
 0x2ce   : > { %6606 = vst.msk [vmem:[%s9877_s7 + $0x280] sm:$0xff] %vm262_vm1, %v8066_v63  ;;  %v7866_v4 = vpop.f32.mrb[50].mxu1  ;;  %v8099_v12 = vadd.f32 %v7966_v62, %v9861_v8  ;;  %v5475_v24 = vpop.f32.mrb[51].mxu0 }
 0x2cf   : > { %v8067_v11 = vadd.f32 %v7866_v4, %v9861_v8  ;;  %v4823_v18 = vpop.f32.mrb[51].mxu1  ;;  %v8100_v13 = vadd.f32 %v9861_v8, %v5475_v24 }
 0x2d0   : > { %v8068_v32 = vadd.f32 %v9861_v8, %v4823_v18  ;;  %6641 = vst.msk [vmem:[%s9877_s7 + $0x398] sm:$0xff] %vm262_vm1, %v8099_v12 }
 0x2d1   : > { %6609 = vst.msk [vmem:[%s9877_s7 + $0x298] sm:$0xff] %vm262_vm1, %v8067_v11  ;;  %6640 = vst.msk [vmem:[%s9877_s7 + $0x390] sm:$0xff] %vm262_vm1, %v8100_v13  ;;  %v7969_v53 = vpop.f32.mrb[52].mxu0 }
 0x2d2   : > { %6608 = vst.msk [vmem:[%s9877_s7 + $0x290] sm:$0xff] %vm262_vm1, %v8068_v32  ;;  %v7869_v17 = vpop.f32.mrb[52].mxu1  ;;  %v8101_v23 = vadd.f32 %v7969_v53, %v9861_v8  ;;  %v5485_v25 = vpop.f32.mrb[53].mxu0 }
 0x2d3   : > { %v8069_v21 = vadd.f32 %v7869_v17, %v9861_v8  ;;  %v4833_v55 = vpop.f32.mrb[53].mxu1  ;;  %v8102_v57 = vadd.f32 %v9861_v8, %v5485_v25 }
 0x2d4   : > { %v8070_v29 = vadd.f32 %v9861_v8, %v4833_v55  ;;  %6643 = vst.msk [vmem:[%s9877_s7 + $0x3a8] sm:$0xff] %vm262_vm1, %v8101_v23 }
 0x2d5   : > { %6611 = vst.msk [vmem:[%s9877_s7 + $0x2a8] sm:$0xff] %vm262_vm1, %v8069_v21  ;;  %6642 = vst.msk [vmem:[%s9877_s7 + $0x3a0] sm:$0xff] %vm262_vm1, %v8102_v57  ;;  %v7972_v36 = vpop.f32.mrb[54].mxu0 }
 0x2d6   : > { %6610 = vst.msk [vmem:[%s9877_s7 + $0x2a0] sm:$0xff] %vm262_vm1, %v8070_v29  ;;  %v7872_v35 = vpop.f32.mrb[54].mxu1  ;;  %v8103_v37 = vadd.f32 %v7972_v36, %v9861_v8  ;;  %v5495_v61 = vpop.f32.mrb[55].mxu0 }
 0x2d7   : > { %v8071_v59 = vadd.f32 %v7872_v35, %v9861_v8  ;;  %v4843_v38 = vpop.f32.mrb[55].mxu1  ;;  %v8104_v43 = vadd.f32 %v9861_v8, %v5495_v61 }
 0x2d8   : > { %v8072_v39 = vadd.f32 %v9861_v8, %v4843_v38  ;;  %6645 = vst.msk [vmem:[%s9877_s7 + $0x3b8] sm:$0xff] %vm262_vm1, %v8103_v37 }
 0x2d9   : > { %6613 = vst.msk [vmem:[%s9877_s7 + $0x2b8] sm:$0xff] %vm262_vm1, %v8071_v59  ;;  %6644 = vst.msk [vmem:[%s9877_s7 + $0x3b0] sm:$0xff] %vm262_vm1, %v8104_v43  ;;  %v7975_v44 = vpop.f32.mrb[56].mxu0 }
 0x2da   : > { %6612 = vst.msk [vmem:[%s9877_s7 + $0x2b0] sm:$0xff] %vm262_vm1, %v8072_v39  ;;  %v7875_v0 = vpop.f32.mrb[56].mxu1  ;;  %v8105_v46 = vadd.f32 %v8522_v45, %v7975_v44  ;;  %v5505_v8 = vpop.f32.mrb[57].mxu0 }
 0x2db   : > { %v8073_v3 = vadd.f32 %v8522_v45, %v7875_v0  ;;  %v4853_v47 = vpop.f32.mrb[57].mxu1  ;;  %v8106_v54 = vadd.f32 %v8522_v45, %v5505_v8 }
 0x2dc   : > { %v8074_v6 = vadd.f32 %v8522_v45, %v4853_v47  ;;  %6647 = vst.msk [vmem:[%s9877_s7 + $0x3c8] sm:$0xff] %vm262_vm1, %v8105_v46 }
 0x2dd   : > { %6615 = vst.msk [vmem:[%s9877_s7 + $0x2c8] sm:$0xff] %vm262_vm1, %v8073_v3  ;;  %6646 = vst.msk [vmem:[%s9877_s7 + $0x3c0] sm:$0xff] %vm262_vm1, %v8106_v54  ;;  %v7978_v7 = vpop.f32.mrb[58].mxu0 }
 0x2de   : > { %6614 = vst.msk [vmem:[%s9877_s7 + $0x2c0] sm:$0xff] %vm262_vm1, %v8074_v6  ;;  %v7878_v56 = vpop.f32.mrb[58].mxu1  ;;  %v8107_v16 = vadd.f32 %v8522_v45, %v7978_v7  ;;  %v5515_v2 = vpop.f32.mrb[59].mxu0 }
 0x2df   : > { %v8075_v58 = vadd.f32 %v8522_v45, %v7878_v56  ;;  %v4863_v10 = vpop.f32.mrb[59].mxu1  ;;  %v8108_v60 = vadd.f32 %v8522_v45, %v5515_v2 }
 0x2e0   : > { %v8076_v14 = vadd.f32 %v8522_v45, %v4863_v10  ;;  %6649 = vst.msk [vmem:[%s9877_s7 + $0x3d8] sm:$0xff] %vm262_vm1, %v8107_v16 }
 0x2e1   : > { %6617 = vst.msk [vmem:[%s9877_s7 + $0x2d8] sm:$0xff] %vm262_vm1, %v8075_v58  ;;  %6648 = vst.msk [vmem:[%s9877_s7 + $0x3d0] sm:$0xff] %vm262_vm1, %v8108_v60  ;;  %v7981_v15 = vpop.f32.mrb[60].mxu0 }
 0x2e2   : > { %6616 = vst.msk [vmem:[%s9877_s7 + $0x2d0] sm:$0xff] %vm262_vm1, %v8076_v14  ;;  %v7881_v22 = vpop.f32.mrb[60].mxu1  ;;  %v8109_v31 = vadd.f32 %v8522_v45, %v7981_v15  ;;  %v5525_v40 = vpop.f32.mrb[61].mxu0 }
 0x2e3   : > { %v8077_v19 = vadd.f32 %v8522_v45, %v7881_v22  ;;  %v4873_v34 = vpop.f32.mrb[61].mxu1  ;;  %v8110_v48 = vadd.f32 %v8522_v45, %v5525_v40 }
 0x2e4   : > { %v8078_v42 = vadd.f32 %v8522_v45, %v4873_v34  ;;  %6651 = vst.msk [vmem:[%s9877_s7 + $0x3e8] sm:$0xff] %vm262_vm1, %v8109_v31 }
 0x2e5   : > { %6619 = vst.msk [vmem:[%s9877_s7 + $0x2e8] sm:$0xff] %vm262_vm1, %v8077_v19  ;;  %6650 = vst.msk [vmem:[%s9877_s7 + $0x3e0] sm:$0xff] %vm262_vm1, %v8110_v48  ;;  %v7984_v1 = vpop.f32.mrb[62].mxu0 }
 0x2e6   : > { %6618 = vst.msk [vmem:[%s9877_s7 + $0x2e0] sm:$0xff] %vm262_vm1, %v8078_v42  ;;  %v7884_v52 = vpop.f32.mrb[62].mxu1  ;;  %v8111_v30 = vadd.f32 %v8522_v45, %v7984_v1  ;;  %v5535_v26 = vpop.f32.mrb[63].mxu0 }
 0x2e7   : > { %v8079_v5 = vadd.f32 %v8522_v45, %v7884_v52  ;;  %v4883_v9 = vpop.f32.mrb[63].mxu1  ;;  %v8112_v49 = vadd.f32 %v8522_v45, %v5535_v26 }
 0x2e8   : > { %v8080_v28 = vadd.f32 %v8522_v45, %v4883_v9  ;;  %6653 = vst.msk [vmem:[%s9877_s7 + $0x3f8] sm:$0xff] %vm262_vm1, %v8111_v30 }
 0x2e9   : > { %6621 = vst.msk [vmem:[%s9877_s7 + $0x2f8] sm:$0xff] %vm262_vm1, %v8079_v5  ;;  %6652 = vst.msk [vmem:[%s9877_s7 + $0x3f0] sm:$0xff] %vm262_vm1, %v8112_v49 }
 0x2ea   : > { %6620 = vst.msk [vmem:[%s9877_s7 + $0x2f0] sm:$0xff] %vm262_vm1, %v8080_v28 }
 0x2eb PF: > { %s13_s14 = sadd.s32 1, %s8545_s14   ;;  %s10644_s12 = smov %s8541_s13 }
 0x2ec   : > { %p10_p5 = scmp.ge.s32.totalorder %s13_s14, 4   ;;  %s10645_s13 = smov %s10647_s15 }
 0x2ee   :  { %12 = sbr.rel (!%p10_p5) target bundleno = 2 (0x2), region = 88 }

</bundles_post_ra>
